<compile_context>
chip_gen: v6e
topology: v6e:2x2x1
jax: 0.10.0
libtpu: 0.0.40
codegen_flags: <defaults>
</compile_context>

<pallas_src>
import jax
import jax.numpy as jnp
from jax import lax
from jax.experimental import pallas as pl
from jax.experimental.pallas import tpu as pltpu


def _round_up(n, m):
    return ((n + m - 1) // m) * m


def _pad_to(a, shape):
    return jnp.pad(a, [(0, s - d) for d, s in zip(a.shape, shape)])


def _pick_batch_tiling(B):
    """Batch tile multiple of 16, <=128, >=2 tiles when batch allows (v7x),
    chosen from B to minimize padding waste."""
    n_tiles = max(1, -(-B // 128))
    if B >= 32:
        n_tiles = max(n_tiles, 2)
    Bt = _round_up(-(-B // n_tiles), 16)
    return Bt, n_tiles * Bt


def _rnn_kernel(x_ref,       # (T, Bt, Dp)  bf16  time-major input tile
                wih0_ref,    # (Dp, Hp)     bf16
                whh0_ref,    # (Hp, Hp)     bf16
                b0_ref,      # (1, Hp)      f32   (b_ih0 + b_hh0)
                wih1_ref,    # (Hp, Hp)     bf16
                whh1_ref,    # (Hp, Hp)     bf16
                b1_ref,      # (1, Hp)      f32   (b_ih1 + b_hh1)
                wfc_ref,     # (Hp, Cp)     bf16
                bfc_ref,     # (1, Cp)      f32
                out_ref,     # (Bt, Cp)     f32   lane-dense logits
                xw0_ref,     # (T, Bt, Hp)  f32   scratch: hoisted input proj
                h0_ref,      # (Bt, Hp)     f32   scratch: layer-0 hidden
                h1_ref):     # (Bt, Hp)     f32   scratch: layer-1 hidden
    T, Bt, Dp = x_ref.shape
    Hp = whh0_ref.shape[0]

    # ---- Hoisted layer-0 input projection for ALL timesteps (one big MXU
    # matmul; zero-padded x lanes / weight rows contribute exactly zero).
    # Layer-0 bias is folded in here so the loop never touches b0.
    x2d = x_ref[...].reshape(T * Bt, Dp)
    xw0 = jnp.dot(x2d, wih0_ref[...], preferred_element_type=jnp.float32)
    xw0_ref[...] = (xw0 + b0_ref[...]).reshape(T, Bt, Hp)

    # initial_states = zeros; hidden state persists in VMEM scratch.
    h0_ref[...] = jnp.zeros_like(h0_ref)
    h1_ref[...] = jnp.zeros_like(h1_ref)

    # Hoisted bias broadcast (JAX does not CSE broadcast_in_dim per step).
    b1b = jnp.broadcast_to(b1_ref[...], (Bt, Hp))

    def step(t, carry):
        # Layer 0: precomputed x-projection + recurrent matmul (K=128 push).
        h0 = jnp.tanh(
            xw0_ref[t]
            + jnp.dot(h0_ref[...].astype(jnp.bfloat16), whh0_ref[...],
                      preferred_element_type=jnp.float32))
        # Layer 1: two dots accumulated in f32 (no concat buffer).
        h1 = jnp.tanh(
            jnp.dot(h0.astype(jnp.bfloat16), wih1_ref[...],
                    preferred_element_type=jnp.float32)
            + jnp.dot(h1_ref[...].astype(jnp.bfloat16), whh1_ref[...],
                      preferred_element_type=jnp.float32)
            + b1b)
        h0_ref[...] = h0
        h1_ref[...] = h1
        return carry

    # Partial unroll: enough LLO scheduling visibility without code bloat /
    # spills at large batch tiles.
    unroll = min(T, 8 if Bt >= 128 else 16)
    lax.fori_loop(0, T, step, 0, unroll=unroll)

    # Final classifier on the last hidden state of the top layer.
    logits = (jnp.dot(h1_ref[...].astype(jnp.bfloat16), wfc_ref[...],
                      preferred_element_type=jnp.float32)
              + bfc_ref[...])
    out_ref[...] = logits.astype(out_ref.dtype)


def rnn_model_forward(x, params):
    """x: (B, T, D) float32.  Returns logits (B, num_classes) float32."""
    B, T, D = x.shape
    H = params["whh0"].shape[0]
    C = params["wfc"].shape[1]

    # MXU/lane-friendly padded sizes.
    Dp = _round_up(D, 128)
    Hp = _round_up(H, 128)
    Cp = _round_up(C, 128)
    Bt, Bp = _pick_batch_tiling(B)

    # ---- one-time packing (small fused XLA copies) ----
    # Time-major, batch/lane zero-padded, bf16 for the MXU.
    x_p = jnp.transpose(_pad_to(x, (Bp, T, Dp)), (1, 0, 2)).astype(jnp.bfloat16)

    wih0 = _pad_to(params["wih0"], (Dp, Hp)).astype(jnp.bfloat16)
    whh0 = _pad_to(params["whh0"], (Hp, Hp)).astype(jnp.bfloat16)
    wih1 = _pad_to(params["wih1"], (Hp, Hp)).astype(jnp.bfloat16)
    whh1 = _pad_to(params["whh1"], (Hp, Hp)).astype(jnp.bfloat16)
    b0 = _pad_to(params["b0"], (1, Hp))                       # f32
    b1 = _pad_to(params["b1"], (1, Hp))                       # f32
    wfc = _pad_to(params["wfc"], (Hp, Cp)).astype(jnp.bfloat16)
    bfc = _pad_to(params["bfc"], (1, Cp))                     # f32

    # Explicit scoped-VMEM budget (defaults: 16 MiB v5e / 32 MiB v6e/v7x).
    vmem_need = (
        2 * T * Bt * Dp * 2                       # x block, double buffered
        + T * Bt * Hp * 4                         # xw0 scratch
        + 2 * Bt * Hp * 4                         # h0/h1 scratch
        + 2 * ((Dp * Hp + 3 * Hp * Hp + Hp * Cp) * 2
               + (2 * Hp + Cp) * 4)               # weights/biases, dbl-buffered
        + 2 * Bt * Cp * 4)                        # output, double buffered
    vmem_limit = min(max(24 << 20, 2 * vmem_need), 64 << 20)

    const = lambda shape: pl.BlockSpec(shape, lambda b: tuple(0 for _ in shape))

    out_padded = pl.pallas_call(
        _rnn_kernel,
        out_shape=jax.ShapeDtypeStruct((Bp, Cp), jnp.float32),
        grid_spec=pltpu.PrefetchScalarGridSpec(
            num_scalar_prefetch=0,
            grid=(Bp // Bt,),           # batch tiles only; time loop in-kernel
            in_specs=[
                pl.BlockSpec((T, Bt, Dp), lambda b: (0, b, 0)),   # x
                const((Dp, Hp)),        # wih0
                const((Hp, Hp)),        # whh0
                const((1, Hp)),         # b0
                const((Hp, Hp)),        # wih1
                const((Hp, Hp)),        # whh1
                const((1, Hp)),         # b1
                const((Hp, Cp)),        # wfc
                const((1, Cp)),         # bfc
            ],
            out_specs=pl.BlockSpec((Bt, Cp), lambda b: (b, 0)),   # lane-dense
            scratch_shapes=[
                pltpu.VMEM((T, Bt, Hp), jnp.float32),   # hoisted x @ W_ih0 + b0
                pltpu.VMEM((Bt, Hp), jnp.float32),      # h0
                pltpu.VMEM((Bt, Hp), jnp.float32),      # h1
            ],
        ),
        compiler_params=pltpu.CompilerParams(
            # Batch tiles are independent -> v7x's two TensorCores split them;
            # harmless on single-TC v5e/v6e.
            dimension_semantics=("parallel",),
            vmem_limit_bytes=int(vmem_limit),
        ),
    )(x_p, wih0, whh0, b0, wih1, whh1, b1, wfc, bfc)

    # Slice off batch / class padding (out.view(-1, num_classes) is a no-op).
    return out_padded[:B, :C]


def rnn_model_reference(x, params):
    """Pure-JAX f32 reference matching the PyTorch module (for validation)."""
    B, T, _ = x.shape
    H = params["whh0"].shape[0]
    h0 = jnp.zeros((B, H), jnp.float32)
    h1 = jnp.zeros((B, H), jnp.float32)
    for t in range(T):
        x_t = x[:, t, :]
        h0 = jnp.tanh(x_t @ params["wih0"] + h0 @ params["whh0"] + params["b0"])
        h1 = jnp.tanh(h0 @ params["wih1"] + h1 @ params["whh1"] + params["b1"])
    return h1 @ params["wfc"] + params["bfc"]


def init_params(key, input_size, hidden_size, num_classes):
    """Deterministic init (PyTorch-style uniform bounds); weights stored
    pre-transposed as (in_dim, out_dim); RNN biases pre-summed (b_ih + b_hh)."""
    ks = jax.random.split(key, 10)
    H, D, C = hidden_size, input_size, num_classes
    bnd = 1.0 / (H ** 0.5)
    u = lambda k, shape: jax.random.uniform(k, shape, jnp.float32, -bnd, bnd)
    return {
        "wih0": u(ks[0], (D, H)),
        "whh0": u(ks[1], (H, H)),
        "b0":   u(ks[2], (1, H)) + u(ks[3], (1, H)),
        "wih1": u(ks[4], (H, H)),
        "whh1": u(ks[5], (H, H)),
        "b1":   u(ks[6], (1, H)) + u(ks[7], (1, H)),
        "wfc":  u(ks[8], (H, C)),
        "bfc":  u(ks[9], (1, C)),
    }


if __name__ == "__main__":
    # Shapes consistent with the module spec (input_size=28, hidden_size=128,
    # num_classes=10, num_layers=2); small batch / sequence for a smoke test.
    batch, seq_len = 2, 8
    input_size, hidden_size, num_classes = 28, 128, 10

    key = jax.random.PRNGKey(0)
    k_x, k_p = jax.random.split(key)
    x = jax.random.normal(k_x, (batch, seq_len, input_size), dtype=jnp.float32)
    params = init_params(k_p, input_size, hidden_size, num_classes)

    out = jax.block_until_ready(rnn_model_forward(x, params))
    assert out.shape == (batch, num_classes)

    ref = rnn_model_reference(x, params)
    max_err = float(jnp.max(jnp.abs(out - ref)))
    assert max_err < 5e-2, f"kernel/reference mismatch: max abs err {max_err}"
    print("KERNEL_OK")
</pallas_src>

<mosaic_0001>
module attributes {stable_mosaic.version = 11 : i64} {
  func.func @_rnn_kernel(%arg0: i32, %arg1: memref<8x16x128xbf16, #tpu.memory_space<vmem>>, %arg2: memref<128x128xbf16, #tpu.memory_space<vmem>>, %arg3: memref<128x128xbf16, #tpu.memory_space<vmem>>, %arg4: memref<1x128xf32, #tpu.memory_space<vmem>>, %arg5: memref<128x128xbf16, #tpu.memory_space<vmem>>, %arg6: memref<128x128xbf16, #tpu.memory_space<vmem>>, %arg7: memref<1x128xf32, #tpu.memory_space<vmem>>, %arg8: memref<128x128xbf16, #tpu.memory_space<vmem>>, %arg9: memref<1x128xf32, #tpu.memory_space<vmem>>, %arg10: memref<16x128xf32, #tpu.memory_space<vmem>>, %arg11: memref<8x16x128xf32, #tpu.memory_space<vmem>>, %arg12: memref<16x128xf32, #tpu.memory_space<vmem>>, %arg13: memref<16x128xf32, #tpu.memory_space<vmem>>) attributes {dimension_semantics = [#tpu.dimension_semantics<parallel>], iteration_bounds = array<i64: 1>, scalar_prefetch = 0 : i64, scratch_operands = 3 : i64, tpu.core_type = #tpu.core_type<tc>, window_params = [{transform_indices = @transform_0, window_bounds = array<i64: 8, 16, 128>}, {pipeline_mode = #tpu.pipeline_mode<synchronous>, transform_indices = @transform_1, window_bounds = array<i64: 128, 128>}, {pipeline_mode = #tpu.pipeline_mode<synchronous>, transform_indices = @transform_2, window_bounds = array<i64: 128, 128>}, {pipeline_mode = #tpu.pipeline_mode<synchronous>, transform_indices = @transform_3, window_bounds = array<i64: 1, 128>}, {pipeline_mode = #tpu.pipeline_mode<synchronous>, transform_indices = @transform_4, window_bounds = array<i64: 128, 128>}, {pipeline_mode = #tpu.pipeline_mode<synchronous>, transform_indices = @transform_5, window_bounds = array<i64: 128, 128>}, {pipeline_mode = #tpu.pipeline_mode<synchronous>, transform_indices = @transform_6, window_bounds = array<i64: 1, 128>}, {pipeline_mode = #tpu.pipeline_mode<synchronous>, transform_indices = @transform_7, window_bounds = array<i64: 128, 128>}, {pipeline_mode = #tpu.pipeline_mode<synchronous>, transform_indices = @transform_8, window_bounds = array<i64: 1, 128>}, {transform_indices = @transform_9, window_bounds = array<i64: 16, 128>}]} {
    %c0 = arith.constant 0 : index
    %c0_0 = arith.constant 0 : index
    %c0_1 = arith.constant 0 : index
    %0 = vector.load %arg1[%c0, %c0_0, %c0_1] : memref<8x16x128xbf16, #tpu.memory_space<vmem>>, vector<8x16x128xbf16>
    %1 = vector.shape_cast %0 : vector<8x16x128xbf16> to vector<128x128xbf16>
    %c0_2 = arith.constant 0 : index
    %c0_3 = arith.constant 0 : index
    %2 = vector.load %arg2[%c0_2, %c0_3] : memref<128x128xbf16, #tpu.memory_space<vmem>>, vector<128x128xbf16>
    %cst = arith.constant dense<0.000000e+00> : vector<128x128xf32>
    %3 = tpu.matmul %1, %2, %cst {dimension_numbers = #tpu.dot_dimension_numbers<[1], [0], [0], [1], [0, 0, 1, 1], [], []>} : vector<128x128xbf16>, vector<128x128xbf16>, vector<128x128xf32> -> vector<128x128xf32>
    %c0_4 = arith.constant 0 : index
    %c0_5 = arith.constant 0 : index
    %4 = vector.load %arg4[%c0_4, %c0_5] : memref<1x128xf32, #tpu.memory_space<vmem>>, vector<1x128xf32>
    %5 = vector.broadcast %4 : vector<1x128xf32> to vector<128x128xf32>
    %6 = arith.addf %3, %5 : vector<128x128xf32>
    %7 = vector.shape_cast %6 : vector<128x128xf32> to vector<8x16x128xf32>
    %c0_6 = arith.constant 0 : index
    %c0_7 = arith.constant 0 : index
    %c0_8 = arith.constant 0 : index
    %8 = vector.load %arg11[%c0_6, %c0_7, %c0_8] : memref<8x16x128xf32, #tpu.memory_space<vmem>>, vector<8x16x128xf32>
    tpu.vector_store %arg11[%c0_6, %c0_7, %c0_8], %7 {strides = array<i32>} : memref<8x16x128xf32, #tpu.memory_space<vmem>>, vector<8x16x128xf32>,
    %cst_9 = arith.constant 0.000000e+00 : f32
    %9 = vector.broadcast %cst_9 : f32 to vector<16x128xf32>
    %c0_10 = arith.constant 0 : index
    %c0_11 = arith.constant 0 : index
    %10 = vector.load %arg12[%c0_10, %c0_11] : memref<16x128xf32, #tpu.memory_space<vmem>>, vector<16x128xf32>
    tpu.vector_store %arg12[%c0_10, %c0_11], %9 {strides = array<i32>} : memref<16x128xf32, #tpu.memory_space<vmem>>, vector<16x128xf32>,
    %cst_12 = arith.constant 0.000000e+00 : f32
    %11 = vector.broadcast %cst_12 : f32 to vector<16x128xf32>
    %c0_13 = arith.constant 0 : index
    %c0_14 = arith.constant 0 : index
    %12 = vector.load %arg13[%c0_13, %c0_14] : memref<16x128xf32, #tpu.memory_space<vmem>>, vector<16x128xf32>
    tpu.vector_store %arg13[%c0_13, %c0_14], %11 {strides = array<i32>} : memref<16x128xf32, #tpu.memory_space<vmem>>, vector<16x128xf32>,
    %c0_15 = arith.constant 0 : index
    %c0_16 = arith.constant 0 : index
    %13 = vector.load %arg7[%c0_15, %c0_16] : memref<1x128xf32, #tpu.memory_space<vmem>>, vector<1x128xf32>
    %14 = vector.shape_cast %13 : vector<1x128xf32> to vector<1x128xf32>
    %15 = vector.broadcast %14 : vector<1x128xf32> to vector<16x128xf32>
    %c0_i32 = arith.constant 0 : i32
    %16 = arith.index_cast %c0_i32 : i32 to index
    %c0_17 = arith.constant 0 : index
    %c0_18 = arith.constant 0 : index
    %17 = vector.load %arg11[%16, %c0_17, %c0_18] : memref<8x16x128xf32, #tpu.memory_space<vmem>>, vector<1x16x128xf32>
    %18 = vector.shape_cast %17 : vector<1x16x128xf32> to vector<16x128xf32>
    %c0_19 = arith.constant 0 : index
    %c0_20 = arith.constant 0 : index
    %19 = vector.load %arg12[%c0_19, %c0_20] : memref<16x128xf32, #tpu.memory_space<vmem>>, vector<16x128xf32>
    %20 = arith.truncf %19 : vector<16x128xf32> to vector<16x128xbf16>
    %c0_21 = arith.constant 0 : index
    %c0_22 = arith.constant 0 : index
    %21 = vector.load %arg3[%c0_21, %c0_22] : memref<128x128xbf16, #tpu.memory_space<vmem>>, vector<128x128xbf16>
    %cst_23 = arith.constant dense<0.000000e+00> : vector<16x128xf32>
    %22 = tpu.matmul %20, %21, %cst_23 {dimension_numbers = #tpu.dot_dimension_numbers<[1], [0], [0], [1], [0, 0, 1, 1], [], []>} : vector<16x128xbf16>, vector<128x128xbf16>, vector<16x128xf32> -> vector<16x128xf32>
    %23 = arith.addf %18, %22 : vector<16x128xf32>
    %24 = math.tanh %23 : vector<16x128xf32>
    %25 = arith.truncf %24 : vector<16x128xf32> to vector<16x128xbf16>
    %c0_24 = arith.constant 0 : index
    %c0_25 = arith.constant 0 : index
    %26 = vector.load %arg5[%c0_24, %c0_25] : memref<128x128xbf16, #tpu.memory_space<vmem>>, vector<128x128xbf16>
    %cst_26 = arith.constant dense<0.000000e+00> : vector<16x128xf32>
    %27 = tpu.matmul %25, %26, %cst_26 {dimension_numbers = #tpu.dot_dimension_numbers<[1], [0], [0], [1], [0, 0, 1, 1], [], []>} : vector<16x128xbf16>, vector<128x128xbf16>, vector<16x128xf32> -> vector<16x128xf32>
    %c0_27 = arith.constant 0 : index
    %c0_28 = arith.constant 0 : index
    %28 = vector.load %arg13[%c0_27, %c0_28] : memref<16x128xf32, #tpu.memory_space<vmem>>, vector<16x128xf32>
    %29 = arith.truncf %28 : vector<16x128xf32> to vector<16x128xbf16>
    %c0_29 = arith.constant 0 : index
    %c0_30 = arith.constant 0 : index
    %30 = vector.load %arg6[%c0_29, %c0_30] : memref<128x128xbf16, #tpu.memory_space<vmem>>, vector<128x128xbf16>
    %cst_31 = arith.constant dense<0.000000e+00> : vector<16x128xf32>
    %31 = tpu.matmul %29, %30, %cst_31 {dimension_numbers = #tpu.dot_dimension_numbers<[1], [0], [0], [1], [0, 0, 1, 1], [], []>} : vector<16x128xbf16>, vector<128x128xbf16>, vector<16x128xf32> -> vector<16x128xf32>
    %32 = arith.addf %27, %31 : vector<16x128xf32>
    %33 = arith.addf %32, %15 : vector<16x128xf32>
    %34 = math.tanh %33 : vector<16x128xf32>
    %c0_32 = arith.constant 0 : index
    %c0_33 = arith.constant 0 : index
    %35 = vector.load %arg12[%c0_32, %c0_33] : memref<16x128xf32, #tpu.memory_space<vmem>>, vector<16x128xf32>
    tpu.vector_store %arg12[%c0_32, %c0_33], %24 {strides = array<i32>} : memref<16x128xf32, #tpu.memory_space<vmem>>, vector<16x128xf32>,
    %c0_34 = arith.constant 0 : index
    %c0_35 = arith.constant 0 : index
    %36 = vector.load %arg13[%c0_34, %c0_35] : memref<16x128xf32, #tpu.memory_space<vmem>>, vector<16x128xf32>
    tpu.vector_store %arg13[%c0_34, %c0_35], %34 {strides = array<i32>} : memref<16x128xf32, #tpu.memory_space<vmem>>, vector<16x128xf32>,
    %c1_i32 = arith.constant 1 : i32
    %37 = arith.index_cast %c1_i32 : i32 to index
    %c0_36 = arith.constant 0 : index
    %c0_37 = arith.constant 0 : index
    %38 = vector.load %arg11[%37, %c0_36, %c0_37] : memref<8x16x128xf32, #tpu.memory_space<vmem>>, vector<1x16x128xf32>
    %39 = vector.shape_cast %38 : vector<1x16x128xf32> to vector<16x128xf32>
    %c0_38 = arith.constant 0 : index
    %c0_39 = arith.constant 0 : index
    %40 = vector.load %arg12[%c0_38, %c0_39] : memref<16x128xf32, #tpu.memory_space<vmem>>, vector<16x128xf32>
    %41 = arith.truncf %40 : vector<16x128xf32> to vector<16x128xbf16>
    %c0_40 = arith.constant 0 : index
    %c0_41 = arith.constant 0 : index
    %42 = vector.load %arg3[%c0_40, %c0_41] : memref<128x128xbf16, #tpu.memory_space<vmem>>, vector<128x128xbf16>
    %cst_42 = arith.constant dense<0.000000e+00> : vector<16x128xf32>
    %43 = tpu.matmul %41, %42, %cst_42 {dimension_numbers = #tpu.dot_dimension_numbers<[1], [0], [0], [1], [0, 0, 1, 1], [], []>} : vector<16x128xbf16>, vector<128x128xbf16>, vector<16x128xf32> -> vector<16x128xf32>
    %44 = arith.addf %39, %43 : vector<16x128xf32>
    %45 = math.tanh %44 : vector<16x128xf32>
    %46 = arith.truncf %45 : vector<16x128xf32> to vector<16x128xbf16>
    %c0_43 = arith.constant 0 : index
    %c0_44 = arith.constant 0 : index
    %47 = vector.load %arg5[%c0_43, %c0_44] : memref<128x128xbf16, #tpu.memory_space<vmem>>, vector<128x128xbf16>
    %cst_45 = arith.constant dense<0.000000e+00> : vector<16x128xf32>
    %48 = tpu.matmul %46, %47, %cst_45 {dimension_numbers = #tpu.dot_dimension_numbers<[1], [0], [0], [1], [0, 0, 1, 1], [], []>} : vector<16x128xbf16>, vector<128x128xbf16>, vector<16x128xf32> -> vector<16x128xf32>
    %c0_46 = arith.constant 0 : index
    %c0_47 = arith.constant 0 : index
    %49 = vector.load %arg13[%c0_46, %c0_47] : memref<16x128xf32, #tpu.memory_space<vmem>>, vector<16x128xf32>
    %50 = arith.truncf %49 : vector<16x128xf32> to vector<16x128xbf16>
    %c0_48 = arith.constant 0 : index
    %c0_49 = arith.constant 0 : index
    %51 = vector.load %arg6[%c0_48, %c0_49] : memref<128x128xbf16, #tpu.memory_space<vmem>>, vector<128x128xbf16>
    %cst_50 = arith.constant dense<0.000000e+00> : vector<16x128xf32>
    %52 = tpu.matmul %50, %51, %cst_50 {dimension_numbers = #tpu.dot_dimension_numbers<[1], [0], [0], [1], [0, 0, 1, 1], [], []>} : vector<16x128xbf16>, vector<128x128xbf16>, vector<16x128xf32> -> vector<16x128xf32>
    %53 = arith.addf %48, %52 : vector<16x128xf32>
    %54 = arith.addf %53, %15 : vector<16x128xf32>
    %55 = math.tanh %54 : vector<16x128xf32>
    %c0_51 = arith.constant 0 : index
    %c0_52 = arith.constant 0 : index
    %56 = vector.load %arg12[%c0_51, %c0_52] : memref<16x128xf32, #tpu.memory_space<vmem>>, vector<16x128xf32>
    tpu.vector_store %arg12[%c0_51, %c0_52], %45 {strides = array<i32>} : memref<16x128xf32, #tpu.memory_space<vmem>>, vector<16x128xf32>,
    %c0_53 = arith.constant 0 : index
    %c0_54 = arith.constant 0 : index
    %57 = vector.load %arg13[%c0_53, %c0_54] : memref<16x128xf32, #tpu.memory_space<vmem>>, vector<16x128xf32>
    tpu.vector_store %arg13[%c0_53, %c0_54], %55 {strides = array<i32>} : memref<16x128xf32, #tpu.memory_space<vmem>>, vector<16x128xf32>,
    %c2_i32 = arith.constant 2 : i32
    %58 = arith.index_cast %c2_i32 : i32 to index
    %c0_55 = arith.constant 0 : index
    %c0_56 = arith.constant 0 : index
    %59 = vector.load %arg11[%58, %c0_55, %c0_56] : memref<8x16x128xf32, #tpu.memory_space<vmem>>, vector<1x16x128xf32>
    %60 = vector.shape_cast %59 : vector<1x16x128xf32> to vector<16x128xf32>
    %c0_57 = arith.constant 0 : index
    %c0_58 = arith.constant 0 : index
    %61 = vector.load %arg12[%c0_57, %c0_58] : memref<16x128xf32, #tpu.memory_space<vmem>>, vector<16x128xf32>
    %62 = arith.truncf %61 : vector<16x128xf32> to vector<16x128xbf16>
    %c0_59 = arith.constant 0 : index
    %c0_60 = arith.constant 0 : index
    %63 = vector.load %arg3[%c0_59, %c0_60] : memref<128x128xbf16, #tpu.memory_space<vmem>>, vector<128x128xbf16>
    %cst_61 = arith.constant dense<0.000000e+00> : vector<16x128xf32>
    %64 = tpu.matmul %62, %63, %cst_61 {dimension_numbers = #tpu.dot_dimension_numbers<[1], [0], [0], [1], [0, 0, 1, 1], [], []>} : vector<16x128xbf16>, vector<128x128xbf16>, vector<16x128xf32> -> vector<16x128xf32>
    %65 = arith.addf %60, %64 : vector<16x128xf32>
    %66 = math.tanh %65 : vector<16x128xf32>
    %67 = arith.truncf %66 : vector<16x128xf32> to vector<16x128xbf16>
    %c0_62 = arith.constant 0 : index
    %c0_63 = arith.constant 0 : index
    %68 = vector.load %arg5[%c0_62, %c0_63] : memref<128x128xbf16, #tpu.memory_space<vmem>>, vector<128x128xbf16>
    %cst_64 = arith.constant dense<0.000000e+00> : vector<16x128xf32>
    %69 = tpu.matmul %67, %68, %cst_64 {dimension_numbers = #tpu.dot_dimension_numbers<[1], [0], [0], [1], [0, 0, 1, 1], [], []>} : vector<16x128xbf16>, vector<128x128xbf16>, vector<16x128xf32> -> vector<16x128xf32>
    %c0_65 = arith.constant 0 : index
    %c0_66 = arith.constant 0 : index
    %70 = vector.load %arg13[%c0_65, %c0_66] : memref<16x128xf32, #tpu.memory_space<vmem>>, vector<16x128xf32>
    %71 = arith.truncf %70 : vector<16x128xf32> to vector<16x128xbf16>
    %c0_67 = arith.constant 0 : index
    %c0_68 = arith.constant 0 : index
    %72 = vector.load %arg6[%c0_67, %c0_68] : memref<128x128xbf16, #tpu.memory_space<vmem>>, vector<128x128xbf16>
    %cst_69 = arith.constant dense<0.000000e+00> : vector<16x128xf32>
    %73 = tpu.matmul %71, %72, %cst_69 {dimension_numbers = #tpu.dot_dimension_numbers<[1], [0], [0], [1], [0, 0, 1, 1], [], []>} : vector<16x128xbf16>, vector<128x128xbf16>, vector<16x128xf32> -> vector<16x128xf32>
    %74 = arith.addf %69, %73 : vector<16x128xf32>
    %75 = arith.addf %74, %15 : vector<16x128xf32>
    %76 = math.tanh %75 : vector<16x128xf32>
    %c0_70 = arith.constant 0 : index
    %c0_71 = arith.constant 0 : index
    %77 = vector.load %arg12[%c0_70, %c0_71] : memref<16x128xf32, #tpu.memory_space<vmem>>, vector<16x128xf32>
    tpu.vector_store %arg12[%c0_70, %c0_71], %66 {strides = array<i32>} : memref<16x128xf32, #tpu.memory_space<vmem>>, vector<16x128xf32>,
    %c0_72 = arith.constant 0 : index
    %c0_73 = arith.constant 0 : index
    %78 = vector.load %arg13[%c0_72, %c0_73] : memref<16x128xf32, #tpu.memory_space<vmem>>, vector<16x128xf32>
    tpu.vector_store %arg13[%c0_72, %c0_73], %76 {strides = array<i32>} : memref<16x128xf32, #tpu.memory_space<vmem>>, vector<16x128xf32>,
    %c3_i32 = arith.constant 3 : i32
    %79 = arith.index_cast %c3_i32 : i32 to index
    %c0_74 = arith.constant 0 : index
    %c0_75 = arith.constant 0 : index
    %80 = vector.load %arg11[%79, %c0_74, %c0_75] : memref<8x16x128xf32, #tpu.memory_space<vmem>>, vector<1x16x128xf32>
    %81 = vector.shape_cast %80 : vector<1x16x128xf32> to vector<16x128xf32>
    %c0_76 = arith.constant 0 : index
    %c0_77 = arith.constant 0 : index
    %82 = vector.load %arg12[%c0_76, %c0_77] : memref<16x128xf32, #tpu.memory_space<vmem>>, vector<16x128xf32>
    %83 = arith.truncf %82 : vector<16x128xf32> to vector<16x128xbf16>
    %c0_78 = arith.constant 0 : index
    %c0_79 = arith.constant 0 : index
    %84 = vector.load %arg3[%c0_78, %c0_79] : memref<128x128xbf16, #tpu.memory_space<vmem>>, vector<128x128xbf16>
    %cst_80 = arith.constant dense<0.000000e+00> : vector<16x128xf32>
    %85 = tpu.matmul %83, %84, %cst_80 {dimension_numbers = #tpu.dot_dimension_numbers<[1], [0], [0], [1], [0, 0, 1, 1], [], []>} : vector<16x128xbf16>, vector<128x128xbf16>, vector<16x128xf32> -> vector<16x128xf32>
    %86 = arith.addf %81, %85 : vector<16x128xf32>
    %87 = math.tanh %86 : vector<16x128xf32>
    %88 = arith.truncf %87 : vector<16x128xf32> to vector<16x128xbf16>
    %c0_81 = arith.constant 0 : index
    %c0_82 = arith.constant 0 : index
    %89 = vector.load %arg5[%c0_81, %c0_82] : memref<128x128xbf16, #tpu.memory_space<vmem>>, vector<128x128xbf16>
    %cst_83 = arith.constant dense<0.000000e+00> : vector<16x128xf32>
    %90 = tpu.matmul %88, %89, %cst_83 {dimension_numbers = #tpu.dot_dimension_numbers<[1], [0], [0], [1], [0, 0, 1, 1], [], []>} : vector<16x128xbf16>, vector<128x128xbf16>, vector<16x128xf32> -> vector<16x128xf32>
    %c0_84 = arith.constant 0 : index
    %c0_85 = arith.constant 0 : index
    %91 = vector.load %arg13[%c0_84, %c0_85] : memref<16x128xf32, #tpu.memory_space<vmem>>, vector<16x128xf32>
    %92 = arith.truncf %91 : vector<16x128xf32> to vector<16x128xbf16>
    %c0_86 = arith.constant 0 : index
    %c0_87 = arith.constant 0 : index
    %93 = vector.load %arg6[%c0_86, %c0_87] : memref<128x128xbf16, #tpu.memory_space<vmem>>, vector<128x128xbf16>
    %cst_88 = arith.constant dense<0.000000e+00> : vector<16x128xf32>
    %94 = tpu.matmul %92, %93, %cst_88 {dimension_numbers = #tpu.dot_dimension_numbers<[1], [0], [0], [1], [0, 0, 1, 1], [], []>} : vector<16x128xbf16>, vector<128x128xbf16>, vector<16x128xf32> -> vector<16x128xf32>
    %95 = arith.addf %90, %94 : vector<16x128xf32>
    %96 = arith.addf %95, %15 : vector<16x128xf32>
    %97 = math.tanh %96 : vector<16x128xf32>
    %c0_89 = arith.constant 0 : index
    %c0_90 = arith.constant 0 : index
    %98 = vector.load %arg12[%c0_89, %c0_90] : memref<16x128xf32, #tpu.memory_space<vmem>>, vector<16x128xf32>
    tpu.vector_store %arg12[%c0_89, %c0_90], %87 {strides = array<i32>} : memref<16x128xf32, #tpu.memory_space<vmem>>, vector<16x128xf32>,
    %c0_91 = arith.constant 0 : index
    %c0_92 = arith.constant 0 : index
    %99 = vector.load %arg13[%c0_91, %c0_92] : memref<16x128xf32, #tpu.memory_space<vmem>>, vector<16x128xf32>
    tpu.vector_store %arg13[%c0_91, %c0_92], %97 {strides = array<i32>} : memref<16x128xf32, #tpu.memory_space<vmem>>, vector<16x128xf32>,
    %c4_i32 = arith.constant 4 : i32
    %100 = arith.index_cast %c4_i32 : i32 to index
    %c0_93 = arith.constant 0 : index
    %c0_94 = arith.constant 0 : index
    %101 = vector.load %arg11[%100, %c0_93, %c0_94] : memref<8x16x128xf32, #tpu.memory_space<vmem>>, vector<1x16x128xf32>
    %102 = vector.shape_cast %101 : vector<1x16x128xf32> to vector<16x128xf32>
    %c0_95 = arith.constant 0 : index
    %c0_96 = arith.constant 0 : index
    %103 = vector.load %arg12[%c0_95, %c0_96] : memref<16x128xf32, #tpu.memory_space<vmem>>, vector<16x128xf32>
    %104 = arith.truncf %103 : vector<16x128xf32> to vector<16x128xbf16>
    %c0_97 = arith.constant 0 : index
    %c0_98 = arith.constant 0 : index
    %105 = vector.load %arg3[%c0_97, %c0_98] : memref<128x128xbf16, #tpu.memory_space<vmem>>, vector<128x128xbf16>
    %cst_99 = arith.constant dense<0.000000e+00> : vector<16x128xf32>
    %106 = tpu.matmul %104, %105, %cst_99 {dimension_numbers = #tpu.dot_dimension_numbers<[1], [0], [0], [1], [0, 0, 1, 1], [], []>} : vector<16x128xbf16>, vector<128x128xbf16>, vector<16x128xf32> -> vector<16x128xf32>
    %107 = arith.addf %102, %106 : vector<16x128xf32>
    %108 = math.tanh %107 : vector<16x128xf32>
    %109 = arith.truncf %108 : vector<16x128xf32> to vector<16x128xbf16>
    %c0_100 = arith.constant 0 : index
    %c0_101 = arith.constant 0 : index
    %110 = vector.load %arg5[%c0_100, %c0_101] : memref<128x128xbf16, #tpu.memory_space<vmem>>, vector<128x128xbf16>
    %cst_102 = arith.constant dense<0.000000e+00> : vector<16x128xf32>
    %111 = tpu.matmul %109, %110, %cst_102 {dimension_numbers = #tpu.dot_dimension_numbers<[1], [0], [0], [1], [0, 0, 1, 1], [], []>} : vector<16x128xbf16>, vector<128x128xbf16>, vector<16x128xf32> -> vector<16x128xf32>
    %c0_103 = arith.constant 0 : index
    %c0_104 = arith.constant 0 : index
    %112 = vector.load %arg13[%c0_103, %c0_104] : memref<16x128xf32, #tpu.memory_space<vmem>>, vector<16x128xf32>
    %113 = arith.truncf %112 : vector<16x128xf32> to vector<16x128xbf16>
    %c0_105 = arith.constant 0 : index
    %c0_106 = arith.constant 0 : index
    %114 = vector.load %arg6[%c0_105, %c0_106] : memref<128x128xbf16, #tpu.memory_space<vmem>>, vector<128x128xbf16>
    %cst_107 = arith.constant dense<0.000000e+00> : vector<16x128xf32>
    %115 = tpu.matmul %113, %114, %cst_107 {dimension_numbers = #tpu.dot_dimension_numbers<[1], [0], [0], [1], [0, 0, 1, 1], [], []>} : vector<16x128xbf16>, vector<128x128xbf16>, vector<16x128xf32> -> vector<16x128xf32>
    %116 = arith.addf %111, %115 : vector<16x128xf32>
    %117 = arith.addf %116, %15 : vector<16x128xf32>
    %118 = math.tanh %117 : vector<16x128xf32>
    %c0_108 = arith.constant 0 : index
    %c0_109 = arith.constant 0 : index
    %119 = vector.load %arg12[%c0_108, %c0_109] : memref<16x128xf32, #tpu.memory_space<vmem>>, vector<16x128xf32>
    tpu.vector_store %arg12[%c0_108, %c0_109], %108 {strides = array<i32>} : memref<16x128xf32, #tpu.memory_space<vmem>>, vector<16x128xf32>,
    %c0_110 = arith.constant 0 : index
    %c0_111 = arith.constant 0 : index
    %120 = vector.load %arg13[%c0_110, %c0_111] : memref<16x128xf32, #tpu.memory_space<vmem>>, vector<16x128xf32>
    tpu.vector_store %arg13[%c0_110, %c0_111], %118 {strides = array<i32>} : memref<16x128xf32, #tpu.memory_space<vmem>>, vector<16x128xf32>,
    %c5_i32 = arith.constant 5 : i32
    %121 = arith.index_cast %c5_i32 : i32 to index
    %c0_112 = arith.constant 0 : index
    %c0_113 = arith.constant 0 : index
    %122 = vector.load %arg11[%121, %c0_112, %c0_113] : memref<8x16x128xf32, #tpu.memory_space<vmem>>, vector<1x16x128xf32>
    %123 = vector.shape_cast %122 : vector<1x16x128xf32> to vector<16x128xf32>
    %c0_114 = arith.constant 0 : index
    %c0_115 = arith.constant 0 : index
    %124 = vector.load %arg12[%c0_114, %c0_115] : memref<16x128xf32, #tpu.memory_space<vmem>>, vector<16x128xf32>
    %125 = arith.truncf %124 : vector<16x128xf32> to vector<16x128xbf16>
    %c0_116 = arith.constant 0 : index
    %c0_117 = arith.constant 0 : index
    %126 = vector.load %arg3[%c0_116, %c0_117] : memref<128x128xbf16, #tpu.memory_space<vmem>>, vector<128x128xbf16>
    %cst_118 = arith.constant dense<0.000000e+00> : vector<16x128xf32>
    %127 = tpu.matmul %125, %126, %cst_118 {dimension_numbers = #tpu.dot_dimension_numbers<[1], [0], [0], [1], [0, 0, 1, 1], [], []>} : vector<16x128xbf16>, vector<128x128xbf16>, vector<16x128xf32> -> vector<16x128xf32>
    %128 = arith.addf %123, %127 : vector<16x128xf32>
    %129 = math.tanh %128 : vector<16x128xf32>
    %130 = arith.truncf %129 : vector<16x128xf32> to vector<16x128xbf16>
    %c0_119 = arith.constant 0 : index
    %c0_120 = arith.constant 0 : index
    %131 = vector.load %arg5[%c0_119, %c0_120] : memref<128x128xbf16, #tpu.memory_space<vmem>>, vector<128x128xbf16>
    %cst_121 = arith.constant dense<0.000000e+00> : vector<16x128xf32>
    %132 = tpu.matmul %130, %131, %cst_121 {dimension_numbers = #tpu.dot_dimension_numbers<[1], [0], [0], [1], [0, 0, 1, 1], [], []>} : vector<16x128xbf16>, vector<128x128xbf16>, vector<16x128xf32> -> vector<16x128xf32>
    %c0_122 = arith.constant 0 : index
    %c0_123 = arith.constant 0 : index
    %133 = vector.load %arg13[%c0_122, %c0_123] : memref<16x128xf32, #tpu.memory_space<vmem>>, vector<16x128xf32>
    %134 = arith.truncf %133 : vector<16x128xf32> to vector<16x128xbf16>
    %c0_124 = arith.constant 0 : index
    %c0_125 = arith.constant 0 : index
    %135 = vector.load %arg6[%c0_124, %c0_125] : memref<128x128xbf16, #tpu.memory_space<vmem>>, vector<128x128xbf16>
    %cst_126 = arith.constant dense<0.000000e+00> : vector<16x128xf32>
    %136 = tpu.matmul %134, %135, %cst_126 {dimension_numbers = #tpu.dot_dimension_numbers<[1], [0], [0], [1], [0, 0, 1, 1], [], []>} : vector<16x128xbf16>, vector<128x128xbf16>, vector<16x128xf32> -> vector<16x128xf32>
    %137 = arith.addf %132, %136 : vector<16x128xf32>
    %138 = arith.addf %137, %15 : vector<16x128xf32>
    %139 = math.tanh %138 : vector<16x128xf32>
    %c0_127 = arith.constant 0 : index
    %c0_128 = arith.constant 0 : index
    %140 = vector.load %arg12[%c0_127, %c0_128] : memref<16x128xf32, #tpu.memory_space<vmem>>, vector<16x128xf32>
    tpu.vector_store %arg12[%c0_127, %c0_128], %129 {strides = array<i32>} : memref<16x128xf32, #tpu.memory_space<vmem>>, vector<16x128xf32>,
    %c0_129 = arith.constant 0 : index
    %c0_130 = arith.constant 0 : index
    %141 = vector.load %arg13[%c0_129, %c0_130] : memref<16x128xf32, #tpu.memory_space<vmem>>, vector<16x128xf32>
    tpu.vector_store %arg13[%c0_129, %c0_130], %139 {strides = array<i32>} : memref<16x128xf32, #tpu.memory_space<vmem>>, vector<16x128xf32>,
    %c6_i32 = arith.constant 6 : i32
    %142 = arith.index_cast %c6_i32 : i32 to index
    %c0_131 = arith.constant 0 : index
    %c0_132 = arith.constant 0 : index
    %143 = vector.load %arg11[%142, %c0_131, %c0_132] : memref<8x16x128xf32, #tpu.memory_space<vmem>>, vector<1x16x128xf32>
    %144 = vector.shape_cast %143 : vector<1x16x128xf32> to vector<16x128xf32>
    %c0_133 = arith.constant 0 : index
    %c0_134 = arith.constant 0 : index
    %145 = vector.load %arg12[%c0_133, %c0_134] : memref<16x128xf32, #tpu.memory_space<vmem>>, vector<16x128xf32>
    %146 = arith.truncf %145 : vector<16x128xf32> to vector<16x128xbf16>
    %c0_135 = arith.constant 0 : index
    %c0_136 = arith.constant 0 : index
    %147 = vector.load %arg3[%c0_135, %c0_136] : memref<128x128xbf16, #tpu.memory_space<vmem>>, vector<128x128xbf16>
    %cst_137 = arith.constant dense<0.000000e+00> : vector<16x128xf32>
    %148 = tpu.matmul %146, %147, %cst_137 {dimension_numbers = #tpu.dot_dimension_numbers<[1], [0], [0], [1], [0, 0, 1, 1], [], []>} : vector<16x128xbf16>, vector<128x128xbf16>, vector<16x128xf32> -> vector<16x128xf32>
    %149 = arith.addf %144, %148 : vector<16x128xf32>
    %150 = math.tanh %149 : vector<16x128xf32>
    %151 = arith.truncf %150 : vector<16x128xf32> to vector<16x128xbf16>
    %c0_138 = arith.constant 0 : index
    %c0_139 = arith.constant 0 : index
    %152 = vector.load %arg5[%c0_138, %c0_139] : memref<128x128xbf16, #tpu.memory_space<vmem>>, vector<128x128xbf16>
    %cst_140 = arith.constant dense<0.000000e+00> : vector<16x128xf32>
    %153 = tpu.matmul %151, %152, %cst_140 {dimension_numbers = #tpu.dot_dimension_numbers<[1], [0], [0], [1], [0, 0, 1, 1], [], []>} : vector<16x128xbf16>, vector<128x128xbf16>, vector<16x128xf32> -> vector<16x128xf32>
    %c0_141 = arith.constant 0 : index
    %c0_142 = arith.constant 0 : index
    %154 = vector.load %arg13[%c0_141, %c0_142] : memref<16x128xf32, #tpu.memory_space<vmem>>, vector<16x128xf32>
    %155 = arith.truncf %154 : vector<16x128xf32> to vector<16x128xbf16>
    %c0_143 = arith.constant 0 : index
    %c0_144 = arith.constant 0 : index
    %156 = vector.load %arg6[%c0_143, %c0_144] : memref<128x128xbf16, #tpu.memory_space<vmem>>, vector<128x128xbf16>
    %cst_145 = arith.constant dense<0.000000e+00> : vector<16x128xf32>
    %157 = tpu.matmul %155, %156, %cst_145 {dimension_numbers = #tpu.dot_dimension_numbers<[1], [0], [0], [1], [0, 0, 1, 1], [], []>} : vector<16x128xbf16>, vector<128x128xbf16>, vector<16x128xf32> -> vector<16x128xf32>
    %158 = arith.addf %153, %157 : vector<16x128xf32>
    %159 = arith.addf %158, %15 : vector<16x128xf32>
    %160 = math.tanh %159 : vector<16x128xf32>
    %c0_146 = arith.constant 0 : index
    %c0_147 = arith.constant 0 : index
    %161 = vector.load %arg12[%c0_146, %c0_147] : memref<16x128xf32, #tpu.memory_space<vmem>>, vector<16x128xf32>
    tpu.vector_store %arg12[%c0_146, %c0_147], %150 {strides = array<i32>} : memref<16x128xf32, #tpu.memory_space<vmem>>, vector<16x128xf32>,
    %c0_148 = arith.constant 0 : index
    %c0_149 = arith.constant 0 : index
    %162 = vector.load %arg13[%c0_148, %c0_149] : memref<16x128xf32, #tpu.memory_space<vmem>>, vector<16x128xf32>
    tpu.vector_store %arg13[%c0_148, %c0_149], %160 {strides = array<i32>} : memref<16x128xf32, #tpu.memory_space<vmem>>, vector<16x128xf32>,
    %c7_i32 = arith.constant 7 : i32
    %163 = arith.index_cast %c7_i32 : i32 to index
    %c0_150 = arith.constant 0 : index
    %c0_151 = arith.constant 0 : index
    %164 = vector.load %arg11[%163, %c0_150, %c0_151] : memref<8x16x128xf32, #tpu.memory_space<vmem>>, vector<1x16x128xf32>
    %165 = vector.shape_cast %164 : vector<1x16x128xf32> to vector<16x128xf32>
    %c0_152 = arith.constant 0 : index
    %c0_153 = arith.constant 0 : index
    %166 = vector.load %arg12[%c0_152, %c0_153] : memref<16x128xf32, #tpu.memory_space<vmem>>, vector<16x128xf32>
    %167 = arith.truncf %166 : vector<16x128xf32> to vector<16x128xbf16>
    %c0_154 = arith.constant 0 : index
    %c0_155 = arith.constant 0 : index
    %168 = vector.load %arg3[%c0_154, %c0_155] : memref<128x128xbf16, #tpu.memory_space<vmem>>, vector<128x128xbf16>
    %cst_156 = arith.constant dense<0.000000e+00> : vector<16x128xf32>
    %169 = tpu.matmul %167, %168, %cst_156 {dimension_numbers = #tpu.dot_dimension_numbers<[1], [0], [0], [1], [0, 0, 1, 1], [], []>} : vector<16x128xbf16>, vector<128x128xbf16>, vector<16x128xf32> -> vector<16x128xf32>
    %170 = arith.addf %165, %169 : vector<16x128xf32>
    %171 = math.tanh %170 : vector<16x128xf32>
    %172 = arith.truncf %171 : vector<16x128xf32> to vector<16x128xbf16>
    %c0_157 = arith.constant 0 : index
    %c0_158 = arith.constant 0 : index
    %173 = vector.load %arg5[%c0_157, %c0_158] : memref<128x128xbf16, #tpu.memory_space<vmem>>, vector<128x128xbf16>
    %cst_159 = arith.constant dense<0.000000e+00> : vector<16x128xf32>
    %174 = tpu.matmul %172, %173, %cst_159 {dimension_numbers = #tpu.dot_dimension_numbers<[1], [0], [0], [1], [0, 0, 1, 1], [], []>} : vector<16x128xbf16>, vector<128x128xbf16>, vector<16x128xf32> -> vector<16x128xf32>
    %c0_160 = arith.constant 0 : index
    %c0_161 = arith.constant 0 : index
    %175 = vector.load %arg13[%c0_160, %c0_161] : memref<16x128xf32, #tpu.memory_space<vmem>>, vector<16x128xf32>
    %176 = arith.truncf %175 : vector<16x128xf32> to vector<16x128xbf16>
    %c0_162 = arith.constant 0 : index
    %c0_163 = arith.constant 0 : index
    %177 = vector.load %arg6[%c0_162, %c0_163] : memref<128x128xbf16, #tpu.memory_space<vmem>>, vector<128x128xbf16>
    %cst_164 = arith.constant dense<0.000000e+00> : vector<16x128xf32>
    %178 = tpu.matmul %176, %177, %cst_164 {dimension_numbers = #tpu.dot_dimension_numbers<[1], [0], [0], [1], [0, 0, 1, 1], [], []>} : vector<16x128xbf16>, vector<128x128xbf16>, vector<16x128xf32> -> vector<16x128xf32>
    %179 = arith.addf %174, %178 : vector<16x128xf32>
    %180 = arith.addf %179, %15 : vector<16x128xf32>
    %181 = math.tanh %180 : vector<16x128xf32>
    %c0_165 = arith.constant 0 : index
    %c0_166 = arith.constant 0 : index
    %182 = vector.load %arg12[%c0_165, %c0_166] : memref<16x128xf32, #tpu.memory_space<vmem>>, vector<16x128xf32>
    tpu.vector_store %arg12[%c0_165, %c0_166], %171 {strides = array<i32>} : memref<16x128xf32, #tpu.memory_space<vmem>>, vector<16x128xf32>,
    %c0_167 = arith.constant 0 : index
    %c0_168 = arith.constant 0 : index
    %183 = vector.load %arg13[%c0_167, %c0_168] : memref<16x128xf32, #tpu.memory_space<vmem>>, vector<16x128xf32>
    tpu.vector_store %arg13[%c0_167, %c0_168], %181 {strides = array<i32>} : memref<16x128xf32, #tpu.memory_space<vmem>>, vector<16x128xf32>,
    %c8_i32 = arith.constant 8 : i32
    %c0_169 = arith.constant 0 : index
    %c0_170 = arith.constant 0 : index
    %184 = vector.load %arg13[%c0_169, %c0_170] : memref<16x128xf32, #tpu.memory_space<vmem>>, vector<16x128xf32>
    %185 = arith.truncf %184 : vector<16x128xf32> to vector<16x128xbf16>
    %c0_171 = arith.constant 0 : index
    %c0_172 = arith.constant 0 : index
    %186 = vector.load %arg8[%c0_171, %c0_172] : memref<128x128xbf16, #tpu.memory_space<vmem>>, vector<128x128xbf16>
    %cst_173 = arith.constant dense<0.000000e+00> : vector<16x128xf32>
    %187 = tpu.matmul %185, %186, %cst_173 {dimension_numbers = #tpu.dot_dimension_numbers<[1], [0], [0], [1], [0, 0, 1, 1], [], []>} : vector<16x128xbf16>, vector<128x128xbf16>, vector<16x128xf32> -> vector<16x128xf32>
    %c0_174 = arith.constant 0 : index
    %c0_175 = arith.constant 0 : index
    %188 = vector.load %arg9[%c0_174, %c0_175] : memref<1x128xf32, #tpu.memory_space<vmem>>, vector<1x128xf32>
    %189 = vector.broadcast %188 : vector<1x128xf32> to vector<16x128xf32>
    %190 = arith.addf %187, %189 : vector<16x128xf32>
    %c0_176 = arith.constant 0 : index
    %c0_177 = arith.constant 0 : index
    %191 = vector.load %arg10[%c0_176, %c0_177] : memref<16x128xf32, #tpu.memory_space<vmem>>, vector<16x128xf32>
    tpu.vector_store %arg10[%c0_176, %c0_177], %190 {strides = array<i32>} : memref<16x128xf32, #tpu.memory_space<vmem>>, vector<16x128xf32>,
    return
  }
  func.func @transform_0(%arg0: i32) -> (i32, i32, i32) {
    %c0_i32 = arith.constant 0 : i32
    %c0_i32_0 = arith.constant 0 : i32
    %c0_i32_1 = arith.constant 0 : i32
    return %c0_i32, %arg0, %c0_i32_0 : i32, i32, i32
  }
  func.func @transform_1(%arg0: i32) -> (i32, i32) {
    %c0_i32 = arith.constant 0 : i32
    %c0_i32_0 = arith.constant 0 : i32
    %c0_i32_1 = arith.constant 0 : i32
    return %c0_i32, %c0_i32_0 : i32, i32
  }
  func.func @transform_2(%arg0: i32) -> (i32, i32) {
    %c0_i32 = arith.constant 0 : i32
    %c0_i32_0 = arith.constant 0 : i32
    %c0_i32_1 = arith.constant 0 : i32
    return %c0_i32, %c0_i32_0 : i32, i32
  }
  func.func @transform_3(%arg0: i32) -> (i32, i32) {
    %c0_i32 = arith.constant 0 : i32
    %c0_i32_0 = arith.constant 0 : i32
    %c0_i32_1 = arith.constant 0 : i32
    return %c0_i32, %c0_i32_0 : i32, i32
  }
  func.func @transform_4(%arg0: i32) -> (i32, i32) {
    %c0_i32 = arith.constant 0 : i32
    %c0_i32_0 = arith.constant 0 : i32
    %c0_i32_1 = arith.constant 0 : i32
    return %c0_i32, %c0_i32_0 : i32, i32
  }
  func.func @transform_5(%arg0: i32) -> (i32, i32) {
    %c0_i32 = arith.constant 0 : i32
    %c0_i32_0 = arith.constant 0 : i32
    %c0_i32_1 = arith.constant 0 : i32
    return %c0_i32, %c0_i32_0 : i32, i32
  }
  func.func @transform_6(%arg0: i32) -> (i32, i32) {
    %c0_i32 = arith.constant 0 : i32
    %c0_i32_0 = arith.constant 0 : i32
    %c0_i32_1 = arith.constant 0 : i32
    return %c0_i32, %c0_i32_0 : i32, i32
  }
  func.func @transform_7(%arg0: i32) -> (i32, i32) {
    %c0_i32 = arith.constant 0 : i32
    %c0_i32_0 = arith.constant 0 : i32
    %c0_i32_1 = arith.constant 0 : i32
    return %c0_i32, %c0_i32_0 : i32, i32
  }
  func.func @transform_8(%arg0: i32) -> (i32, i32) {
    %c0_i32 = arith.constant 0 : i32
    %c0_i32_0 = arith.constant 0 : i32
    %c0_i32_1 = arith.constant 0 : i32
    return %c0_i32, %c0_i32_0 : i32, i32
  }
  func.func @transform_9(%arg0: i32) -> (i32, i32) {
    %c0_i32 = arith.constant 0 : i32
    %c0_i32_0 = arith.constant 0 : i32
    return %arg0, %c0_i32 : i32, i32
  }
}

</mosaic_0001>

<bundles_post_ra>
// kernel: tpu_custom_call.1
= control target key start
LH: loop header
LB: loop body
LE: loop exit
PB: predicated region body
PF: predicated region fallthrough
CT: control target
= control target key end

     0   :  { %14 = vsyncpa [#allocation6], 0  ;;  %s5071_s0 = inlined_call_operand.hbm [shape: bf16[8,16,128], index: 0, kind: input, shape index: {}]   ;;  %s5072_s1 = inlined_call_operand.hbm [shape: bf16[128,128], index: 1, kind: input, shape index: {}]   ;;  %s5073_s2 = inlined_call_operand.hbm [shape: bf16[128,128], index: 2, kind: input, shape index: {}]   ;;  %s5074_s3 = inlined_call_operand.vmem [shape: f32[1,128], index: 3, kind: input, shape index: {}]   ;;  %s5075_s4 = inlined_call_operand.hbm [shape: bf16[128,128], index: 4, kind: input, shape index: {}]   ;;  %s5076_s5 = inlined_call_operand.hbm [shape: bf16[128,128], index: 5, kind: input, shape index: {}]   ;;  %s5077_s6 = inlined_call_operand.vmem [shape: f32[1,128], index: 6, kind: input, shape index: {}]   ;;  %s5078_s7 = inlined_call_operand.hbm [shape: bf16[128,128], index: 7, kind: input, shape index: {}]   ;;  %s5079_s8 = inlined_call_operand.vmem [shape: f32[1,128], index: 8, kind: input, shape index: {}]   ;;  %s5080_s9 = inlined_call_operand.hbm [shape: f32[16,128], index: 9, kind: output, shape index: {}]  }
   0x1   :  { %15 = vsyncpa [#allocation9], 0 }
   0x2   :  { %16 = vsyncpa [#allocation12], 0 }
   0x3   :  { %17 = vsyncpa [#allocation15], 0 }
   0x4   :  { %18 = vsyncpa [#allocation7], 0  ;;  %s4644_s30 = smov [#allocation8]   ;;  %s4645_s11 = smov [#allocation11]  }
   0x5   :  { %s36_s10 = sshll.u32 %s4644_s30, 4  ;;  %s62_s12 = sshll.u32 %s4645_s11, 4  ;;  %s37_s10 = int_to_ptr.vmem [resolvable:$true] %s36_s10  ;;  %s63_s12 = int_to_ptr.vmem [resolvable:$true] %s62_s12 }
   0x6   :  { %s4502_s13 = scalar_lea.vmem %s37_s10, 1024  ;;  %p4507_p1 = scmp.lt.s32.totalorder %s37_s10, %s37_s10 }
   0x7   :  { %p4503_p0 = scmp.ne.s32.totalorder %s37_s10, %s4502_s13  ;;  %p4508_p2 = scmp.lt.s32.totalorder %s4502_s13, %s4502_s13 }
   0x9   :  { %p4509_p3 = por %p4508_p2, %p4507_p1 }
   0xb   :  { %p4510_p4 = pnand %p4509_p3, %p4503_p0 }
   0xd   :  { %4513 = shalt.err (!%p4510_p4)
}
   0xe   :  { %s4646_s14 = smov 64   ;;  %s4647_s15 = smov 4  }
   0xf   :  { %42 = dma.hbm_to_vmem [thread:$0]  %s5072_s1, 1024, %s37_s10, [#allocation9], %s4646_s14, %s4646_s14, %s4647_s15  }
  0x10   :  { %s4522_s18 = scalar_lea.vmem %s63_s12, 1024  ;;  %p4527_p6 = scmp.lt.s32.totalorder %s63_s12, %s63_s12 }
  0x11   :  { %p4523_p5 = scmp.ne.s32.totalorder %s63_s12, %s4522_s18  ;;  %p4528_p7 = scmp.lt.s32.totalorder %s4522_s18, %s4522_s18 }
  0x13   :  { %p4529_p8 = por %p4528_p7, %p4527_p6 }
  0x15   :  { %p4530_p9 = pnand %p4529_p8, %p4523_p5 }
  0x17   :  { %4533 = shalt.err (!%p4530_p9)
}
  0x18   :  { %68 = dma.hbm_to_vmem [thread:$0]  %s5075_s4, 1024, %s63_s12, [#allocation12], %s4646_s14, %s4646_s14, %s4647_s15  }
  0x19   :  { %s4648_s21 = smov [#allocation5]   ;;  %s4649_s23 = smov [#allocation10]  }
  0x1a   :  { %s24_s22 = sshll.u32 %s4648_s21, 4  ;;  %s48_s24 = sshll.u32 %s4649_s23, 4  ;;  %s25_s22 = int_to_ptr.vmem [resolvable:$true] %s24_s22  ;;  %s49_s24 = int_to_ptr.vmem [resolvable:$true] %s48_s24 }
  0x1b   :  { %s4542_s1 = scalar_lea.vmem %s25_s22, 1024  ;;  %p4547_p11 = scmp.lt.s32.totalorder %s25_s22, %s25_s22 }
  0x1c   :  { %p4543_p10 = scmp.ne.s32.totalorder %s25_s22, %s4542_s1  ;;  %p4548_p12 = scmp.lt.s32.totalorder %s4542_s1, %s4542_s1 }
  0x1e   :  { %p4549_p13 = por %p4548_p12, %p4547_p11 }
  0x20   :  { %p4550_p0 = pnand %p4549_p13, %p4543_p10 }
  0x22   :  { %4553 = shalt.err (!%p4550_p0)
}
  0x23   :  { %30 = dma.hbm_to_vmem [thread:$0]  %s5071_s0, 1024, %s25_s22, [#allocation6], %s4646_s14, %s4646_s14, %s4647_s15  }
  0x24   :  { %s4562_s4 = scalar_lea.vmem %s49_s24, 1024  ;;  %p4567_p2 = scmp.lt.s32.totalorder %s49_s24, %s49_s24 }
  0x25   :  { %p4563_p1 = scmp.ne.s32.totalorder %s49_s24, %s4562_s4  ;;  %p4568_p3 = scmp.lt.s32.totalorder %s4562_s4, %s4562_s4 }
  0x27   :  { %p4569_p4 = por %p4568_p3, %p4567_p2 }
  0x29   :  { %p4570_p5 = pnand %p4569_p4, %p4563_p1 }
  0x2b   :  { %4573 = shalt.err (!%p4570_p5)
}
  0x2c   :  { %54 = dma.hbm_to_vmem [thread:$0]  %s5073_s2, 1024, %s49_s24, [#allocation9], %s4646_s14, %s4646_s14, %s4647_s15  }
  0x2d   :  { %s4650_s29 = smov [#allocation13]   ;;  %s4651_s10 = smov [#allocation14]  }
  0x2e   :  { %s74_s30 = sshll.u32 %s4650_s29, 4  ;;  %s88_s11 = sshll.u32 %s4651_s10, 4  ;;  %s75_s30 = int_to_ptr.vmem [resolvable:$true] %s74_s30  ;;  %s89_s11 = int_to_ptr.vmem [resolvable:$true] %s88_s11 }
  0x2f   :  { %s4582_s0 = scalar_lea.vmem %s75_s30, 1024  ;;  %p4587_p7 = scmp.lt.s32.totalorder %s75_s30, %s75_s30 }
  0x30   :  { %p4583_p6 = scmp.ne.s32.totalorder %s75_s30, %s4582_s0  ;;  %p4588_p8 = scmp.lt.s32.totalorder %s4582_s0, %s4582_s0 }
  0x32   :  { %p4589_p9 = por %p4588_p8, %p4587_p7 }
  0x34   :  { %p4590_p10 = pnand %p4589_p9, %p4583_p6 }
  0x36   :  { %4593 = shalt.err (!%p4590_p10)
}
  0x37   :  { %80 = dma.hbm_to_vmem [thread:$0]  %s5076_s5, 1024, %s75_s30, [#allocation12], %s4646_s14, %s4646_s14, %s4647_s15  }
  0x38   :  { %s4602_s2 = scalar_lea.vmem %s89_s11, 1024  ;;  %p4607_p12 = scmp.lt.s32.totalorder %s89_s11, %s89_s11 }
  0x39   :  { %p4603_p11 = scmp.ne.s32.totalorder %s89_s11, %s4602_s2  ;;  %p4608_p13 = scmp.lt.s32.totalorder %s4602_s2, %s4602_s2 }
  0x3b   :  { %p4609_p0 = por %p4608_p13, %p4607_p12 }
  0x3d   :  { %p4610_p1 = pnand %p4609_p0, %p4603_p11 }
  0x3f   :  { %4613 = shalt.err (!%p4610_p1)
}
  0x40   :  { %94 = dma.hbm_to_vmem [thread:$0]  %s5078_s7, 1024, %s89_s11, [#allocation15], %s4646_s14, %s4646_s14, %s4647_s15  }
  0x41   :  { %4634 = dma.done.wait [#allocation6], 1024  }
  0x42   :  { %4635 = vsyncadd [#allocation6], 4294966272 }
  0x43   :  { %4636 = dma.done.wait [#allocation9], 2048  }
  0x44   :  { %4637 = vsyncadd [#allocation9], 4294965248 }
  0x45   :  { %4638 = dma.done.wait [#allocation12], 2048  }
  0x46   :  { %4639 = vsyncadd [#allocation12], 4294965248 }
  0x47   :  { %4640 = dma.done.wait [#allocation15], 1024  }
  0x48   :  { %4641 = vsyncadd [#allocation15], 4294966272  ;;  %v4652_v0 = vmov 0.0   ;;  %vm4653_vm0 = vmmov 0   ;;  %v4213_v1 = vld [vmem:[#allocation8 + $0x38] sm:$0xff]   ;;  %v4215_v3 = vld [vmem:[#allocation8 + $0x30] sm:$0xff]  }
  0x49   :  { %3699 = vmatprep.subr.bf16.mxu1 %v4652_v0  ;;  %3715 = vmatprep.mubr.msk.bf16.mxu1 %vm4653_vm0, %v4652_v0  ;;  %v4214_v2 = vld [vmem:[#allocation10 + $0x38] sm:$0xff]   ;;  %v4216_v4 = vld [vmem:[#allocation10 + $0x30] sm:$0xff]   ;;  %v4217_v5 = vld [vmem:[#allocation8 + $0x28] sm:$0xff]   ;;  %v4654_v23 = vmov 0.0|0.0   ;;  %s4655_s20 = smov [#allocation16]  }
  0x4a   :  { %3667 = vmatprep.subr.bf16.mxu0 %v4213_v1  ;;  %3700 = vmatpush3.bf16.msra.mxu1 %v4214_v2  ;;  %v4218_v6 = vld [vmem:[#allocation10 + $0x28] sm:$0xff]   ;;  %v4219_v7 = vld [vmem:[#allocation8 + $0x20] sm:$0xff]   ;;  %v4221_v9 = vld [vmem:[#allocation8 + $0x18] sm:$0xff]   ;;  %s3192_s21 = sshll.u32 %s4655_s20, 4  ;;  %s3193_s21 = int_to_ptr.vmem [resolvable:$true] %s3192_s21 }
  0x4b   :  { %3668 = vmatpush3.bf16.msra.mxu0 %v4213_v1  ;;  %3701 = vmatprep.subr.bf16.mxu1 %v4652_v0  ;;  %v4220_v8 = vld [vmem:[#allocation10 + $0x20] sm:$0xff]   ;;  %v4222_v10 = vld [vmem:[#allocation10 + $0x18] sm:$0xff]   ;;  %v4223_v11 = vld [vmem:[#allocation8 + $0x10] sm:$0xff]   ;;  %s4614_s22 = scalar_lea.vmem %s3193_s21, 256  ;;  %p4619_p3 = scmp.lt.s32.totalorder %s3193_s21, %s3193_s21 }
  0x4c   :  { %3669 = vmatprep.subr.bf16.mxu0 %v4215_v3  ;;  %v4229_v12 = vld [vmem:[#allocation5] sm:$0xff]   ;;  %v4224_v13 = vld [vmem:[#allocation10 + $0x10] sm:$0xff]   ;;  %v4225_v14 = vld [vmem:[#allocation8 + $0x8] sm:$0xff]   ;;  %p4615_p2 = scmp.ne.s32.totalorder %s3193_s21, %s4614_s22  ;;  %p4620_p4 = scmp.lt.s32.totalorder %s4614_s22, %s4614_s22 }
  0x4d   :  { %3683 = vmatprep.mubr.bf16.mxu0 %v4229_v12  ;;  %v4226_v15 = vld [vmem:[#allocation10 + $0x8] sm:$0xff]   ;;  %v4227_v16 = vld [vmem:[#allocation8] sm:$0xff]   ;;  %v4231_v19 = vld [vmem:[#allocation13 + $0x38] sm:$0xff]  }
  0x4e   :  { %3702 = vmatpush3.bf16.msra.mxu1 %v4216_v4  ;;  %v4228_v17 = vld [vmem:[#allocation10] sm:$0xff]   ;;  %v4230_v18 = vld [vmem:[#allocation5 + $0x8] sm:$0xff]   ;;  %v4233_v20 = vld [vmem:[#allocation5 + $0x10] sm:$0xff]   ;;  %p4621_p5 = por %p4620_p4, %p4619_p3 }
  0x4f   :  { %3670 = vmatpush3.bf16.msra.mxu0 %v4215_v3  ;;  %3703 = vmatprep.subr.bf16.mxu1 %v4652_v0  ;;  %v4245_v21 = vld [vmem:[#allocation11 + $0x38] sm:$0xff]   ;;  %v4232_v22 = vld [vmem:[#allocation13 + $0x30] sm:$0xff]   ;;  %v4235_v25 = vld [vmem:[#allocation13 + $0x28] sm:$0xff]  }
  0x50   :  { %3671 = vmatprep.subr.bf16.mxu0 %v4217_v5  ;;  %v4234_v24 = vld [vmem:[#allocation5 + $0x18] sm:$0xff]   ;;  %v4237_v26 = vld [vmem:[#allocation5 + $0x20] sm:$0xff]   ;;  %v4238_v28 = vld [vmem:[#allocation5 + $0x28] sm:$0xff]   ;;  %p4622_p6 = pnand %p4621_p5, %p4615_p2 }
  0x51   :  { %v4236_v27 = vld [vmem:[#allocation13 + $0x20] sm:$0xff]   ;;  %v4239_v29 = vld [vmem:[#allocation13 + $0x18] sm:$0xff]   ;;  %v4241_v30 = vld [vmem:[#allocation5 + $0x30] sm:$0xff]  }
  0x52   :  { %3704 = vmatpush3.bf16.msra.mxu1 %v4218_v6  ;;  %v4240_v31 = vld [vmem:[#allocation13 + $0x10] sm:$0xff]   ;;  %v4242_v32 = vld [vmem:[#allocation5 + $0x38] sm:$0xff]   ;;  %v4243_v33 = vld [vmem:[#allocation13 + $0x8] sm:$0xff]  }
  0x53   :  { %3672 = vmatpush3.bf16.msra.mxu0 %v4217_v5  ;;  %3705 = vmatprep.subr.bf16.mxu1 %v4652_v0  ;;  %v4244_v34 = vld [vmem:[#allocation13] sm:$0xff]   ;;  %v4246_v35 = vld [vmem:[#allocation10 + $0x38] sm:$0xff]   ;;  %v4247_v36 = vld [vmem:[#allocation11 + $0x30] sm:$0xff]  }
  0x54   :  { %3673 = vmatprep.subr.bf16.mxu0 %v4219_v7  ;;  %v4248_v37 = vld [vmem:[#allocation10 + $0x30] sm:$0xff]   ;;  %v4249_v38 = vld [vmem:[#allocation11 + $0x28] sm:$0xff]   ;;  %v4251_v40 = vld [vmem:[#allocation11 + $0x20] sm:$0xff]  }
  0x55   :  { %v4250_v39 = vld [vmem:[#allocation10 + $0x28] sm:$0xff]   ;;  %v4252_v41 = vld [vmem:[#allocation10 + $0x20] sm:$0xff]   ;;  %v4253_v42 = vld [vmem:[#allocation11 + $0x18] sm:$0xff]  }
  0x56   :  { %3706 = vmatpush3.bf16.msra.mxu1 %v4220_v8  ;;  %v4254_v43 = vld [vmem:[#allocation10 + $0x18] sm:$0xff]   ;;  %v4255_v44 = vld [vmem:[#allocation11 + $0x10] sm:$0xff]   ;;  %v4257_v46 = vld [vmem:[#allocation11 + $0x8] sm:$0xff]  }
  0x57   :  { %3674 = vmatpush3.bf16.msra.mxu0 %v4219_v7  ;;  %3707 = vmatprep.subr.bf16.mxu1 %v4652_v0  ;;  %v4256_v45 = vld [vmem:[#allocation10 + $0x10] sm:$0xff]   ;;  %v4258_v47 = vld [vmem:[#allocation10 + $0x8] sm:$0xff]   ;;  %v4259_v48 = vld [vmem:[#allocation11] sm:$0xff]  }
  0x58   :  { %3675 = vmatprep.subr.bf16.mxu0 %v4221_v9  ;;  %v4260_v49 = vld [vmem:[#allocation10] sm:$0xff]  }
  0x59   :  { %v3207_v50 = vld [vmem:[%s5074_s3] ss:$0 sm:$0xff] }
  0x5a   :  { %3708 = vmatpush3.bf16.msra.mxu1 %v4222_v10 }
  0x5b   :  { %3676 = vmatpush3.bf16.msra.mxu0 %v4221_v9  ;;  %3709 = vmatprep.subr.bf16.mxu1 %v4652_v0 }
  0x5c   :  { %3677 = vmatprep.subr.bf16.mxu0 %v4223_v11 }
  0x5e   :  { %3710 = vmatpush3.bf16.msra.mxu1 %v4224_v13 }
  0x5f   :  { %3678 = vmatpush3.bf16.msra.mxu0 %v4223_v11  ;;  %3711 = vmatprep.subr.bf16.mxu1 %v4652_v0 }
  0x60   :  { %3679 = vmatprep.subr.bf16.mxu0 %v4225_v14 }
  0x62   :  { %3712 = vmatpush3.bf16.msra.mxu1 %v4226_v15 }
  0x63   :  { %3680 = vmatpush3.bf16.msra.mxu0 %v4225_v14  ;;  %3713 = vmatprep.subr.bf16.mxu1 %v4652_v0 }
  0x64   :  { %3681 = vmatprep.subr.bf16.mxu0 %v4227_v16 }
  0x66   :  { %3714 = vmatpush3.bf16.msra.mxu1 %v4228_v17 }
  0x67   :  { %3682 = vmatpush3.bf16.msra.mxu0 %v4227_v16  ;;  %3739 = vmatprep.subr.bf16.mxu1 %v4652_v0 }
  0x68   :  { %3719 = vmatprep.subr.bf16.mxu0 %v4652_v0 }
  0x69   :  { %3716 = vmatmul.mubr.bf16.vlgmr.msra.gmra.mxu1 %v4654_v23 }
  0x6a   :  { %3684 = vmatmul.mubr.bf16.vlgmr.msra.gmra.mxu0 %v4230_v18  ;;  %3740 = vmatpush3.bf16.msra.mxu1 %v4245_v21  ;;  %v4261_v21 = vld [vmem:[#allocation11 + $0x38] sm:$0xff]  }
  0x6b   :  { %3720 = vmatpush3.bf16.msra.mxu0 %v4231_v19  ;;  %3687 = vmatprep.mubr.bf16.mxu0 %v4233_v20 }
  0x6c   :  { %3721 = vmatprep.subr.bf16.mxu0 %v4652_v0  ;;  %3741 = vmatprep.subr.bf16.mxu1 %v4652_v0 }
  0x6d   :  { %3755 = vmatprep.mubr.msk.bf16.mxu1 %vm4653_vm0, %v4652_v0 }
  0x6e   :  { %3742 = vmatpush3.bf16.msra.mxu1 %v4247_v36 }
  0x6f   :  { %3722 = vmatpush3.bf16.msra.mxu0 %v4232_v22  ;;  %3743 = vmatprep.subr.bf16.mxu1 %v4652_v0  ;;  %v4262_v22 = vld [vmem:[#allocation13 + $0x38] sm:$0xff]  }
  0x70   :  { %3723 = vmatprep.subr.bf16.mxu0 %v4652_v0 }
  0x72   :  { %3688 = vmatmul.mubr.bf16.gmra.mxu0 %v4234_v24  ;;  %3744 = vmatpush3.bf16.msra.mxu1 %v4249_v38  ;;  %v4266_v38 = vld [vmem:[#allocation13 + $0x28] sm:$0xff]  }
  0x73   :  { %3724 = vmatpush3.bf16.msra.mxu0 %v4235_v25  ;;  %3691 = vmatprep.mubr.bf16.mxu0 %v4237_v26 }
  0x74   :  { %3725 = vmatprep.subr.bf16.mxu0 %v4652_v0  ;;  %3745 = vmatprep.subr.bf16.mxu1 %v4652_v0 }
  0x76   :  { %3746 = vmatpush3.bf16.msra.mxu1 %v4251_v40  ;;  %v4268_v40 = vld [vmem:[#allocation13 + $0x20] sm:$0xff]  }
  0x77   :  { %3726 = vmatpush3.bf16.msra.mxu0 %v4236_v27  ;;  %3747 = vmatprep.subr.bf16.mxu1 %v4652_v0 }
  0x78   :  { %3727 = vmatprep.subr.bf16.mxu0 %v4652_v0 }
  0x7a   :  { %3692 = vmatmul.mubr.bf16.gmra.mxu0 %v4238_v28  ;;  %3748 = vmatpush3.bf16.msra.mxu1 %v4253_v42  ;;  %v4263_v28 = vld [vmem:[#allocation11 + $0x30] sm:$0xff]   ;;  %v4270_v42 = vld [vmem:[#allocation13 + $0x18] sm:$0xff]  }
  0x7b   :  { %3728 = vmatpush3.bf16.msra.mxu0 %v4239_v29  ;;  %3695 = vmatprep.mubr.bf16.mxu0 %v4241_v30  ;;  %v4264_v29 = vld [vmem:[#allocation13 + $0x30] sm:$0xff]  }
  0x7c   :  { %3729 = vmatprep.subr.bf16.mxu0 %v4652_v0  ;;  %3749 = vmatprep.subr.bf16.mxu1 %v4652_v0 }
  0x7e   :  { %3750 = vmatpush3.bf16.msra.mxu1 %v4255_v44  ;;  %v4272_v44 = vld [vmem:[#allocation13 + $0x10] sm:$0xff]  }
  0x7f   :  { %3730 = vmatpush3.bf16.msra.mxu0 %v4240_v31  ;;  %3751 = vmatprep.subr.bf16.mxu1 %v4652_v0 }
  0x80   :  { %3731 = vmatprep.subr.bf16.mxu0 %v4652_v0 }
  0x82   :  { %3696 = vmatmul.mubr.bf16.gmra.mxu0 %v4242_v32  ;;  %3752 = vmatpush3.bf16.msra.mxu1 %v4257_v46  ;;  %v4274_v46 = vld [vmem:[#allocation13 + $0x8] sm:$0xff]  }
  0x83   :  { %3732 = vmatpush3.bf16.msra.mxu0 %v4243_v33  ;;  %3735 = vmatprep.mubr.msk.bf16.mxu0 %vm4653_vm0, %v4652_v0 }
  0x84   :  { %3733 = vmatprep.subr.bf16.mxu0 %v4652_v0  ;;  %3753 = vmatprep.subr.bf16.mxu1 %v4652_v0 }
  0x86   :  { %3754 = vmatpush3.bf16.msra.mxu1 %v4259_v48  ;;  %v4276_v48 = vld [vmem:[#allocation13] sm:$0xff]  }
  0x87   :  { %3734 = vmatpush3.bf16.msra.mxu0 %v4244_v34  ;;  %3779 = vmatprep.subr.bf16.mxu1 %v4652_v0 }
  0x88   :  { %3759 = vmatprep.subr.bf16.mxu0 %v4652_v0 }
  0x8a   :  { %3736 = vmatmul.mubr.bf16.vlgmr.msra.gmra.mxu0 %v4654_v23 }
  0x8b   :  { %3760 = vmatpush3.bf16.msra.mxu0 %v4246_v35  ;;  %3775 = vmatprep.mubr.msk.bf16.mxu0 %vm4653_vm0, %v4652_v0 }
  0x8c   :  { %3761 = vmatprep.subr.bf16.mxu0 %v4652_v0 }
  0x8f   :  { %3762 = vmatpush3.bf16.msra.mxu0 %v4248_v37  ;;  %v4265_v37 = vld [vmem:[#allocation11 + $0x28] sm:$0xff]  }
  0x90   :  { %3763 = vmatprep.subr.bf16.mxu0 %v4652_v0 }
  0x93   :  { %3764 = vmatpush3.bf16.msra.mxu0 %v4250_v39  ;;  %v4267_v39 = vld [vmem:[#allocation11 + $0x20] sm:$0xff]  }
  0x94   :  { %3765 = vmatprep.subr.bf16.mxu0 %v4652_v0 }
  0x97   :  { %3766 = vmatpush3.bf16.msra.mxu0 %v4252_v41  ;;  %v4269_v41 = vld [vmem:[#allocation11 + $0x18] sm:$0xff]  }
  0x98   :  { %3767 = vmatprep.subr.bf16.mxu0 %v4652_v0 }
  0x9b   :  { %3768 = vmatpush3.bf16.msra.mxu0 %v4254_v43  ;;  %v4271_v43 = vld [vmem:[#allocation11 + $0x10] sm:$0xff]  }
  0x9c   :  { %3769 = vmatprep.subr.bf16.mxu0 %v4652_v0 }
  0x9f   :  { %3770 = vmatpush3.bf16.msra.mxu0 %v4256_v45  ;;  %v4273_v45 = vld [vmem:[#allocation11 + $0x8] sm:$0xff]  }
  0xa0   :  { %3771 = vmatprep.subr.bf16.mxu0 %v4652_v0 }
  0xa3   :  { %3772 = vmatpush3.bf16.msra.mxu0 %v4258_v47  ;;  %v4275_v47 = vld [vmem:[#allocation11] sm:$0xff]  }
  0xa4   :  { %3773 = vmatprep.subr.bf16.mxu0 %v4652_v0 }
  0xa7   :  { %3774 = vmatpush3.bf16.msra.mxu0 %v4260_v49 }
  0xa8   :  { %3799 = vmatprep.subr.bf16.mxu0 %v4652_v0 }
 0x129   :  { %v478_v51 = vpop.f32.mrf.mxu1 }
 0x12a   :  { %v3685_v52 = vpop.f32.mrf.mxu0 }
 0x12b   :  { %v4789_v53 = vadd.f32 %v3685_v52, %v3207_v50  ;;  %v3717_v54 = vpop.f32.mrf.mxu1 }
 0x12c   :  { %v285_v55 = vpop.f32.mrf.mxu0 }
 0x12d   :  { %v286_v56 = vadd.f32 %v3207_v50, %v285_v55  ;;  %v481_v57 = vpop.f32.mrf.mxu1 }
 0x12e   :  { %v3686_v58 = vpop.f32.mrf.mxu0 }
 0x12f   :  { %v4791_v59 = vadd.f32 %v3686_v58, %v3207_v50  ;;  %v485_v60 = vadd.f32 %v478_v51, %v286_v56  ;;  %v3718_v61 = vpop.f32.mrf.mxu1  ;;  %v4840_v51 = vld [vmem:[%s5077_s6] ss:$0 sm:$0xff] }
 0x130   :  { %v288_v62 = vpop.f32.mrf.mxu0 }
 0x131   :  { %v289_v63 = vadd.f32 %v3207_v50, %v288_v62  ;;  %4429 = vtanh.f32 %v485_v60 }
 0x132   :  { %v3689_v1 = vpop.f32.mrf.mxu0 }
 0x133   :  { %v486_v2 = vadd.f32 %v481_v57, %v289_v63  ;;  %v4793_v3 = vadd.f32 %v3689_v1, %v3207_v50 }
 0x134   :  { %v301_v4 = vpop.f32.mrf.mxu0 }
 0x135   :  { %4431 = vtanh.f32 %v486_v2  ;;  %v4795_v5 = vadd.f32 %v3207_v50, %v301_v4 }
 0x136   :  { %v3690_v6 = vpop.f32.mrf.mxu0 }
 0x137   :  { %v4797_v7 = vadd.f32 %v3690_v6, %v3207_v50 }
 0x138   :  { %v304_v8 = vpop.f32.mrf.mxu0 }
 0x139   :  { %v4799_v9 = vadd.f32 %v3207_v50, %v304_v8 }
 0x13a   :  { %v3693_v10 = vpop.f32.mrf.mxu0 }
 0x13b   :  { %v4801_v11 = vadd.f32 %v3693_v10, %v3207_v50 }
 0x13c   :  { %v317_v12 = vpop.f32.mrf.mxu0 }
 0x13d   :  { %v4803_v13 = vadd.f32 %v3207_v50, %v317_v12 }
 0x13e   :  { %v3694_v14 = vpop.f32.mrf.mxu0  ;;  %v4430_v17 = vpop.eup %4429 }
 0x13f   :  { %v4805_v15 = vadd.f32 %v3694_v14, %v3207_v50  ;;  %v4277_v14 = vld [vmem:[#allocation10 + $0x38] sm:$0xff]  }
 0x140   :  { %v320_v16 = vpop.f32.mrf.mxu0 }
 0x141   :  { %v4807_v18 = vadd.f32 %v3207_v50, %v320_v16 }
 0x142   :  { %v4432_v19 = vpop.eup %4431  ;;  %v3697_v20 = vpop.f32.mrf.mxu0 }
 0x143   :  { %v489_v23 = vpack.c.bf16 %v4432_v19, %v4430_v17  ;;  %v4809_v24 = vadd.f32 %v3697_v20, %v3207_v50  ;;  %v4286_v17 = vld [vmem:[#allocation13 + $0x30] sm:$0xff]   ;;  %v4279_v19 = vld [vmem:[#allocation10 + $0x28] sm:$0xff]   ;;  %v4280_v20 = vld [vmem:[#allocation10 + $0x20] sm:$0xff]  }
 0x144   :  { %v333_v25 = vpop.f32.mrf.mxu0 }
 0x145   :  { %3756 = vmatmul.mubr.bf16.vlgmr.msra.gmra.mxu1 %v489_v23  ;;  %3776 = vmatmul.mubr.bf16.vlgmr.msra.gmra.mxu0 %v489_v23  ;;  %v4811_v26 = vadd.f32 %v3207_v50, %v333_v25  ;;  %v4283_v23 = vld [vmem:[#allocation10 + $0x8] sm:$0xff]   ;;  %v4284_v25 = vld [vmem:[#allocation10] sm:$0xff]  }
 0x146   :  { %v3698_v27 = vpop.f32.mrf.mxu0  ;;  %3800 = vmatpush3.bf16.msra.mxu0 %v4261_v21  ;;  %3780 = vmatpush3.bf16.msra.mxu1 %v4262_v22  ;;  %v4281_v21 = vld [vmem:[#allocation10 + $0x18] sm:$0xff]   ;;  %v4282_v22 = vld [vmem:[#allocation10 + $0x10] sm:$0xff]  }
 0x147   :  { %v4813_v30 = vadd.f32 %v3698_v27, %v3207_v50  ;;  %3801 = vmatprep.subr.bf16.mxu0 %v4652_v0  ;;  %3781 = vmatprep.subr.bf16.mxu1 %v4652_v0  ;;  %v4287_v27 = vld [vmem:[#allocation13 + $0x28] sm:$0xff]  }
 0x148   :  { %v336_v31 = vpop.f32.mrf.mxu0  ;;  %3815 = vmatprep.mubr.msk.bf16.mxu0 %vm4653_vm0, %v4652_v0  ;;  %3795 = vmatprep.mubr.msk.bf16.mxu1 %vm4653_vm0, %v4652_v0 }
 0x149   :  { %v4821_v32 = vadd.f32 %v3207_v50, %v336_v31  ;;  %v4290_v31 = vld [vmem:[#allocation13 + $0x10] sm:$0xff]  }
 0x14a   :  { %v607_v33 = vpop.f32.mrf.mxu0  ;;  %3802 = vmatpush3.bf16.msra.mxu0 %v4263_v28  ;;  %3782 = vmatpush3.bf16.msra.mxu1 %v4264_v29  ;;  %v4288_v28 = vld [vmem:[#allocation13 + $0x20] sm:$0xff]   ;;  %v4289_v29 = vld [vmem:[#allocation13 + $0x18] sm:$0xff]  }
 0x14b   :  { %3803 = vmatprep.subr.bf16.mxu0 %v4652_v0  ;;  %3783 = vmatprep.subr.bf16.mxu1 %v4652_v0 }
 0x14c   :  { %v3737_v34 = vpop.f32.mrf.mxu0 }
 0x14d   :  { %v4291_v34 = vld [vmem:[#allocation13 + $0x8] sm:$0xff]  }
 0x14e   :  { %v610_v35 = vpop.f32.mrf.mxu0  ;;  %3804 = vmatpush3.bf16.msra.mxu0 %v4265_v37  ;;  %3784 = vmatpush3.bf16.msra.mxu1 %v4266_v38  ;;  %v4297_v37 = vld [vmem:[#allocation11 + $0x28] sm:$0xff]   ;;  %v4299_v38 = vld [vmem:[#allocation11 + $0x20] sm:$0xff]  }
 0x14f   :  { %3805 = vmatprep.subr.bf16.mxu0 %v4652_v0  ;;  %3785 = vmatprep.subr.bf16.mxu1 %v4652_v0 }
 0x150   :  { %v3738_v36 = vpop.f32.mrf.mxu0 }
 0x151   :  { %v4295_v36 = vld [vmem:[#allocation11 + $0x30] sm:$0xff]  }
 0x152   :  { %3806 = vmatpush3.bf16.msra.mxu0 %v4267_v39  ;;  %3786 = vmatpush3.bf16.msra.mxu1 %v4268_v40  ;;  %v4301_v39 = vld [vmem:[#allocation11 + $0x18] sm:$0xff]   ;;  %v4303_v40 = vld [vmem:[#allocation11 + $0x10] sm:$0xff]  }
 0x153   :  { %3807 = vmatprep.subr.bf16.mxu0 %v4652_v0  ;;  %3787 = vmatprep.subr.bf16.mxu1 %v4652_v0 }
 0x156   :  { %3808 = vmatpush3.bf16.msra.mxu0 %v4269_v41  ;;  %3788 = vmatpush3.bf16.msra.mxu1 %v4270_v42  ;;  %v4305_v41 = vld [vmem:[#allocation11 + $0x8] sm:$0xff]   ;;  %v4307_v42 = vld [vmem:[#allocation11] sm:$0xff]  }
 0x157   :  { %3809 = vmatprep.subr.bf16.mxu0 %v4652_v0  ;;  %3789 = vmatprep.subr.bf16.mxu1 %v4652_v0 }
 0x15a   :  { %3810 = vmatpush3.bf16.msra.mxu0 %v4271_v43  ;;  %3790 = vmatpush3.bf16.msra.mxu1 %v4272_v44 }
 0x15b   :  { %3811 = vmatprep.subr.bf16.mxu0 %v4652_v0  ;;  %3791 = vmatprep.subr.bf16.mxu1 %v4652_v0 }
 0x15e   :  { %3812 = vmatpush3.bf16.msra.mxu0 %v4273_v45  ;;  %3792 = vmatpush3.bf16.msra.mxu1 %v4274_v46 }
 0x15f   :  { %3813 = vmatprep.subr.bf16.mxu0 %v4652_v0  ;;  %3793 = vmatprep.subr.bf16.mxu1 %v4652_v0 }
 0x162   :  { %3814 = vmatpush3.bf16.msra.mxu0 %v4275_v47  ;;  %3794 = vmatpush3.bf16.msra.mxu1 %v4276_v48 }
 0x163   :  { %3839 = vmatprep.subr.bf16.mxu0 %v4652_v0  ;;  %3819 = vmatprep.subr.bf16.mxu1 %v4652_v0 }
 0x205   :  { %v696_v49 = vpop.f32.mrf.mxu1  ;;  %v815_v50 = vpop.f32.mrf.mxu0 }
 0x206   :  { %v697_v52 = vadd.f32 %v696_v49, %v607_v33  ;;  %v822_v54 = vadd.f32 %v815_v50, %v4789_v53  ;;  %v4285_v53 = vld [vmem:[#allocation13 + $0x38] sm:$0xff]  }
 0x207   :  { %v3757_v55 = vpop.f32.mrf.mxu1  ;;  %v3777_v56 = vpop.f32.mrf.mxu0  ;;  %v4293_v33 = vld [vmem:[#allocation11 + $0x38] sm:$0xff]  }
 0x208   :  { %v703_v57 = vadd.f32 %v4840_v51, %v697_v52  ;;  %4433 = vtanh.f32 %v822_v54 }
 0x209   :  { %v699_v58 = vpop.f32.mrf.mxu1  ;;  %v818_v60 = vpop.f32.mrf.mxu0 }
 0x20a   :  { %v700_v61 = vadd.f32 %v699_v58, %v610_v35  ;;  %v823_v62 = vadd.f32 %v818_v60, %v4791_v59  ;;  %v4278_v59 = vld [vmem:[#allocation10 + $0x30] sm:$0xff]   ;;  %v4292_v35 = vld [vmem:[#allocation13] sm:$0xff]   ;;  %v4294_v60 = vld [vmem:[#allocation10 + $0x38] sm:$0xff]  }
 0x20b   :  { %v3758_v63 = vpop.f32.mrf.mxu1  ;;  %v3778_v1 = vpop.f32.mrf.mxu0 }
 0x20c   :  { %v704_v2 = vadd.f32 %v4840_v51, %v700_v61  ;;  %4435 = vtanh.f32 %v823_v62  ;;  %v4296_v62 = vld [vmem:[#allocation10 + $0x30] sm:$0xff]   ;;  %v4298_v63 = vld [vmem:[#allocation10 + $0x28] sm:$0xff]  }
 0x20d   :  { %4437 = vtanh.f32 %v703_v57 }
 0x20e   :  { %4439 = vtanh.f32 %v704_v2 }
 0x215   :  { %v4434_v4 = vpop.eup %4433 }
 0x219   :  { %v4436_v6 = vpop.eup %4435 }
 0x21a   :  { %v4438_v8 = vpop.eup %4437  ;;  %v826_v10 = vpack.c.bf16 %v4436_v6, %v4434_v4  ;;  %v4300_v6 = vld [vmem:[#allocation10 + $0x20] sm:$0xff]  }
 0x21b   :  { %v4440_v12 = vpop.eup %4439 }
 0x21c   :  { %3816 = vmatmul.mubr.bf16.vlgmr.msra.gmra.mxu0 %v826_v10  ;;  %v845_v16 = vpack.c.bf16 %v4440_v12, %v4438_v8  ;;  %v4302_v12 = vld [vmem:[#allocation10 + $0x18] sm:$0xff]  }
 0x21d   :  { %3840 = vmatpush3.bf16.msra.mxu0 %v4285_v53  ;;  %3855 = vmatprep.mubr.msk.bf16.mxu0 %vm4653_vm0, %v4652_v0 }
 0x21e   :  { %3796 = vmatmul.mubr.bf16.vlgmr.msra.gmra.mxu1 %v845_v16  ;;  %3841 = vmatprep.subr.bf16.mxu0 %v4652_v0  ;;  %v4308_v16 = vld [vmem:[#allocation10] sm:$0xff]  }
 0x21f   :  { %3820 = vmatpush3.bf16.msra.mxu1 %v4277_v14  ;;  %3835 = vmatprep.mubr.msk.bf16.mxu1 %vm4653_vm0, %v4652_v0  ;;  %v4304_v14 = vld [vmem:[#allocation10 + $0x10] sm:$0xff]  }
 0x220   :  { %3821 = vmatprep.subr.bf16.mxu1 %v4652_v0 }
 0x221   :  { %3842 = vmatpush3.bf16.msra.mxu0 %v4286_v17 }
 0x222   :  { %3843 = vmatprep.subr.bf16.mxu0 %v4652_v0 }
 0x223   :  { %3822 = vmatpush3.bf16.msra.mxu1 %v4278_v59 }
 0x224   :  { %3823 = vmatprep.subr.bf16.mxu1 %v4652_v0 }
 0x225   :  { %3844 = vmatpush3.bf16.msra.mxu0 %v4287_v27  ;;  %v4315_v27 = vld [vmem:[#allocation13 + $0x20] sm:$0xff]  }
 0x226   :  { %3845 = vmatprep.subr.bf16.mxu0 %v4652_v0 }
 0x227   :  { %3824 = vmatpush3.bf16.msra.mxu1 %v4279_v19  ;;  %v4309_v19 = vld [vmem:[#allocation13 + $0x38] sm:$0xff]  }
 0x228   :  { %3825 = vmatprep.subr.bf16.mxu1 %v4652_v0 }
 0x229   :  { %3846 = vmatpush3.bf16.msra.mxu0 %v4288_v28  ;;  %v4316_v28 = vld [vmem:[#allocation11 + $0x20] sm:$0xff]  }
 0x22a   :  { %3847 = vmatprep.subr.bf16.mxu0 %v4652_v0 }
 0x22b   :  { %3826 = vmatpush3.bf16.msra.mxu1 %v4280_v20  ;;  %v4310_v20 = vld [vmem:[#allocation11 + $0x38] sm:$0xff]  }
 0x22c   :  { %3827 = vmatprep.subr.bf16.mxu1 %v4652_v0 }
 0x22d   :  { %3848 = vmatpush3.bf16.msra.mxu0 %v4289_v29  ;;  %v4317_v29 = vld [vmem:[#allocation13 + $0x18] sm:$0xff]  }
 0x22e   :  { %3849 = vmatprep.subr.bf16.mxu0 %v4652_v0 }
 0x22f   :  { %3828 = vmatpush3.bf16.msra.mxu1 %v4281_v21  ;;  %v4311_v21 = vld [vmem:[#allocation13 + $0x30] sm:$0xff]  }
 0x230   :  { %3829 = vmatprep.subr.bf16.mxu1 %v4652_v0 }
 0x231   :  { %3850 = vmatpush3.bf16.msra.mxu0 %v4290_v31  ;;  %v4318_v31 = vld [vmem:[#allocation11 + $0x18] sm:$0xff]  }
 0x232   :  { %3851 = vmatprep.subr.bf16.mxu0 %v4652_v0 }
 0x233   :  { %3830 = vmatpush3.bf16.msra.mxu1 %v4282_v22  ;;  %v4312_v22 = vld [vmem:[#allocation11 + $0x30] sm:$0xff]  }
 0x234   :  { %3831 = vmatprep.subr.bf16.mxu1 %v4652_v0 }
 0x235   :  { %3852 = vmatpush3.bf16.msra.mxu0 %v4291_v34  ;;  %v4320_v34 = vld [vmem:[#allocation11 + $0x10] sm:$0xff]  }
 0x236   :  { %3853 = vmatprep.subr.bf16.mxu0 %v4652_v0 }
 0x237   :  { %3832 = vmatpush3.bf16.msra.mxu1 %v4283_v23  ;;  %v4313_v23 = vld [vmem:[#allocation13 + $0x28] sm:$0xff]  }
 0x238   :  { %3833 = vmatprep.subr.bf16.mxu1 %v4652_v0 }
 0x239   :  { %3854 = vmatpush3.bf16.msra.mxu0 %v4292_v35  ;;  %v4321_v35 = vld [vmem:[#allocation13 + $0x8] sm:$0xff]  }
 0x23a   :  { %3879 = vmatprep.subr.bf16.mxu0 %v4652_v0 }
 0x23b   :  { %3834 = vmatpush3.bf16.msra.mxu1 %v4284_v25  ;;  %v4314_v25 = vld [vmem:[#allocation11 + $0x28] sm:$0xff]  }
 0x23c   :  { %3859 = vmatprep.subr.bf16.mxu1 %v4652_v0 }
 0x23e   :  { %3836 = vmatmul.mubr.bf16.vlgmr.msra.gmra.mxu1 %v826_v10 }
 0x23f   :  { %3875 = vmatprep.mubr.msk.bf16.mxu1 %vm4653_vm0, %v4652_v0  ;;  %3860 = vmatpush3.bf16.msra.mxu1 %v4293_v33  ;;  %v4319_v33 = vld [vmem:[#allocation13 + $0x10] sm:$0xff]  }
 0x240   :  { %3861 = vmatprep.subr.bf16.mxu1 %v4652_v0 }
 0x243   :  { %3862 = vmatpush3.bf16.msra.mxu1 %v4295_v36  ;;  %v4322_v36 = vld [vmem:[#allocation11 + $0x8] sm:$0xff]  }
 0x244   :  { %3863 = vmatprep.subr.bf16.mxu1 %v4652_v0 }
 0x247   :  { %3864 = vmatpush3.bf16.msra.mxu1 %v4297_v37  ;;  %v4323_v37 = vld [vmem:[#allocation13] sm:$0xff]  }
 0x248   :  { %3865 = vmatprep.subr.bf16.mxu1 %v4652_v0 }
 0x24b   :  { %3866 = vmatpush3.bf16.msra.mxu1 %v4299_v38  ;;  %v4324_v38 = vld [vmem:[#allocation11] sm:$0xff]  }
 0x24c   :  { %3867 = vmatprep.subr.bf16.mxu1 %v4652_v0 }
 0x24f   :  { %3868 = vmatpush3.bf16.msra.mxu1 %v4301_v39 }
 0x250   :  { %3869 = vmatprep.subr.bf16.mxu1 %v4652_v0 }
 0x253   :  { %3870 = vmatpush3.bf16.msra.mxu1 %v4303_v40 }
 0x254   :  { %3871 = vmatprep.subr.bf16.mxu1 %v4652_v0 }
 0x257   :  { %3872 = vmatpush3.bf16.msra.mxu1 %v4305_v41 }
 0x258   :  { %3873 = vmatprep.subr.bf16.mxu1 %v4652_v0 }
 0x25b   :  { %3874 = vmatpush3.bf16.msra.mxu1 %v4307_v42 }
 0x25c   :  { %3899 = vmatprep.subr.bf16.mxu1 %v4652_v0 }
 0x2dc   :  { %v1033_v43 = vpop.f32.mrf.mxu0 }
 0x2de   :  { %v944_v44 = vpop.f32.mrf.mxu1  ;;  %v3817_v45 = vpop.f32.mrf.mxu0 }
 0x2df   :  { %v1034_v46 = vadd.f32 %v1033_v43, %v944_v44 }
 0x2e0   :  { %v3797_v47 = vpop.f32.mrf.mxu1  ;;  %v1036_v48 = vpop.f32.mrf.mxu0 }
 0x2e1   :  { %v1040_v49 = vadd.f32 %v4840_v51, %v1034_v46 }
 0x2e2   :  { %v947_v50 = vpop.f32.mrf.mxu1  ;;  %v3818_v52 = vpop.f32.mrf.mxu0 }
 0x2e3   :  { %v1037_v54 = vadd.f32 %v1036_v48, %v947_v50  ;;  %4441 = vtanh.f32 %v1040_v49 }
 0x2e4   :  { %v3798_v55 = vpop.f32.mrf.mxu1 }
 0x2e5   :  { %v1041_v56 = vadd.f32 %v4840_v51, %v1037_v54 }
 0x2e7   :  { %4443 = vtanh.f32 %v1041_v56 }
 0x2f0   :  { %v4442_v57 = vpop.eup %4441 }
 0x2f4   :  { %v4444_v58 = vpop.eup %4443 }
 0x2f5   :  { %v1182_v61 = vpack.c.bf16 %v4444_v58, %v4442_v57 }
 0x2f7   :  { %3856 = vmatmul.mubr.bf16.vlgmr.msra.gmra.mxu0 %v1182_v61 }
 0x2f8   :  { %3880 = vmatpush3.bf16.msra.mxu0 %v4294_v60  ;;  %3895 = vmatprep.mubr.msk.bf16.mxu0 %vm4653_vm0, %v4652_v0 }
 0x2f9   :  { %3881 = vmatprep.subr.bf16.mxu0 %v4652_v0 }
 0x2fc   :  { %3882 = vmatpush3.bf16.msra.mxu0 %v4296_v62 }
 0x2fd   :  { %3883 = vmatprep.subr.bf16.mxu0 %v4652_v0 }
 0x2fe   :  { %v1152_v1 = vpop.f32.mrf.mxu1 }
 0x2ff   :  { %v1159_v2 = vadd.f32 %v1152_v1, %v4795_v5  ;;  %v4306_v5 = vld [vmem:[#allocation10 + $0x8] sm:$0xff]  }
 0x300   :  { %v3837_v4 = vpop.f32.mrf.mxu1  ;;  %3884 = vmatpush3.bf16.msra.mxu0 %v4298_v63  ;;  %v4325_v63 = vld [vmem:[#allocation10 + $0x38] sm:$0xff]  }
 0x301   :  { %3885 = vmatprep.subr.bf16.mxu0 %v4652_v0  ;;  %4445 = vtanh.f32 %v1159_v2  ;;  %v4333_v4 = vld [vmem:[#allocation13 + $0x38] sm:$0xff]  }
 0x302   :  { %v1155_v53 = vpop.f32.mrf.mxu1 }
 0x303   :  { %v1160_v8 = vadd.f32 %v1155_v53, %v4799_v9  ;;  %v4327_v53 = vld [vmem:[#allocation10 + $0x28] sm:$0xff]  }
 0x304   :  { %v3838_v10 = vpop.f32.mrf.mxu1  ;;  %3886 = vmatpush3.bf16.msra.mxu0 %v4300_v6  ;;  %v4326_v6 = vld [vmem:[#allocation10 + $0x30] sm:$0xff]  }
 0x305   :  { %4447 = vtanh.f32 %v1160_v8  ;;  %3887 = vmatprep.subr.bf16.mxu0 %v4652_v0  ;;  %v4328_v8 = vld [vmem:[#allocation10 + $0x20] sm:$0xff]   ;;  %v4329_v10 = vld [vmem:[#allocation10 + $0x18] sm:$0xff]  }
 0x308   :  { %3888 = vmatpush3.bf16.msra.mxu0 %v4302_v12  ;;  %v4330_v12 = vld [vmem:[#allocation10 + $0x10] sm:$0xff]  }
 0x309   :  { %3889 = vmatprep.subr.bf16.mxu0 %v4652_v0 }
 0x30c   :  { %3890 = vmatpush3.bf16.msra.mxu0 %v4304_v14  ;;  %v4331_v14 = vld [vmem:[#allocation10 + $0x8] sm:$0xff]  }
 0x30d   :  { %3891 = vmatprep.subr.bf16.mxu0 %v4652_v0 }
 0x30e   :  { %v4446_v17 = vpop.eup %4445 }
 0x310   :  { %3892 = vmatpush3.bf16.msra.mxu0 %v4306_v5  ;;  %v4332_v5 = vld [vmem:[#allocation10] sm:$0xff]  }
 0x311   :  { %3893 = vmatprep.subr.bf16.mxu0 %v4652_v0 }
 0x312   :  { %v4448_v9 = vpop.eup %4447 }
 0x313   :  { %v1163_v59 = vpack.c.bf16 %v4448_v9, %v4446_v17  ;;  %v4336_v17 = vld [vmem:[#allocation13 + $0x20] sm:$0xff]   ;;  %v4337_v9 = vld [vmem:[#allocation13 + $0x18] sm:$0xff]  }
 0x314   :  { %3894 = vmatpush3.bf16.msra.mxu0 %v4308_v16  ;;  %v4335_v16 = vld [vmem:[#allocation13 + $0x28] sm:$0xff]  }
 0x315   :  { %3876 = vmatmul.mubr.bf16.vlgmr.msra.gmra.mxu1 %v1163_v59  ;;  %3919 = vmatprep.subr.bf16.mxu0 %v4652_v0 }
 0x316   :  { %3915 = vmatprep.mubr.msk.bf16.mxu1 %vm4653_vm0, %v4652_v0  ;;  %3900 = vmatpush3.bf16.msra.mxu1 %v4309_v19  ;;  %v4341_v19 = vld [vmem:[#allocation11 + $0x38] sm:$0xff]  }
 0x317   :  { %3896 = vmatmul.mubr.bf16.vlgmr.msra.gmra.mxu0 %v1163_v59  ;;  %3901 = vmatprep.subr.bf16.mxu1 %v4652_v0  ;;  %v4338_v59 = vld [vmem:[#allocation13 + $0x10] sm:$0xff]  }
 0x318   :  { %3935 = vmatprep.mubr.msk.bf16.mxu0 %vm4653_vm0, %v4652_v0  ;;  %3920 = vmatpush3.bf16.msra.mxu0 %v4310_v20  ;;  %v4339_v20 = vld [vmem:[#allocation13 + $0x8] sm:$0xff]  }
 0x319   :  { %3921 = vmatprep.subr.bf16.mxu0 %v4652_v0 }
 0x31a   :  { %3902 = vmatpush3.bf16.msra.mxu1 %v4311_v21  ;;  %v4340_v21 = vld [vmem:[#allocation13] sm:$0xff]  }
 0x31b   :  { %3903 = vmatprep.subr.bf16.mxu1 %v4652_v0 }
 0x31c   :  { %3922 = vmatpush3.bf16.msra.mxu0 %v4312_v22  ;;  %v4343_v22 = vld [vmem:[#allocation11 + $0x30] sm:$0xff]  }
 0x31d   :  { %3923 = vmatprep.subr.bf16.mxu0 %v4652_v0 }
 0x31e   :  { %3904 = vmatpush3.bf16.msra.mxu1 %v4313_v23  ;;  %v4345_v23 = vld [vmem:[#allocation11 + $0x28] sm:$0xff]  }
 0x31f   :  { %3905 = vmatprep.subr.bf16.mxu1 %v4652_v0 }
 0x320   :  { %3924 = vmatpush3.bf16.msra.mxu0 %v4314_v25  ;;  %v4347_v25 = vld [vmem:[#allocation11 + $0x20] sm:$0xff]  }
 0x321   :  { %3925 = vmatprep.subr.bf16.mxu0 %v4652_v0 }
 0x322   :  { %3906 = vmatpush3.bf16.msra.mxu1 %v4315_v27  ;;  %v4349_v27 = vld [vmem:[#allocation11 + $0x18] sm:$0xff]  }
 0x323   :  { %3907 = vmatprep.subr.bf16.mxu1 %v4652_v0 }
 0x324   :  { %3926 = vmatpush3.bf16.msra.mxu0 %v4316_v28  ;;  %v4351_v28 = vld [vmem:[#allocation11 + $0x10] sm:$0xff]  }
 0x325   :  { %3927 = vmatprep.subr.bf16.mxu0 %v4652_v0 }
 0x326   :  { %3908 = vmatpush3.bf16.msra.mxu1 %v4317_v29  ;;  %v4353_v29 = vld [vmem:[#allocation11 + $0x8] sm:$0xff]  }
 0x327   :  { %3909 = vmatprep.subr.bf16.mxu1 %v4652_v0 }
 0x328   :  { %3928 = vmatpush3.bf16.msra.mxu0 %v4318_v31  ;;  %v4355_v31 = vld [vmem:[#allocation11] sm:$0xff]  }
 0x329   :  { %3929 = vmatprep.subr.bf16.mxu0 %v4652_v0 }
 0x32a   :  { %3910 = vmatpush3.bf16.msra.mxu1 %v4319_v33 }
 0x32b   :  { %3911 = vmatprep.subr.bf16.mxu1 %v4652_v0 }
 0x32c   :  { %3930 = vmatpush3.bf16.msra.mxu0 %v4320_v34 }
 0x32d   :  { %3931 = vmatprep.subr.bf16.mxu0 %v4652_v0 }
 0x32e   :  { %3912 = vmatpush3.bf16.msra.mxu1 %v4321_v35 }
 0x32f   :  { %3913 = vmatprep.subr.bf16.mxu1 %v4652_v0 }
 0x330   :  { %3932 = vmatpush3.bf16.msra.mxu0 %v4322_v36 }
 0x331   :  { %3933 = vmatprep.subr.bf16.mxu0 %v4652_v0 }
 0x332   :  { %3914 = vmatpush3.bf16.msra.mxu1 %v4323_v37 }
 0x333   :  { %3939 = vmatprep.subr.bf16.mxu1 %v4652_v0 }
 0x334   :  { %3934 = vmatpush3.bf16.msra.mxu0 %v4324_v38 }
 0x335   :  { %3959 = vmatprep.subr.bf16.mxu0 %v4652_v0 }
 0x3b7   :  { %v1281_v39 = vpop.f32.mrf.mxu0 }
 0x3b9   :  { %v3857_v40 = vpop.f32.mrf.mxu0 }
 0x3bb   :  { %v1284_v41 = vpop.f32.mrf.mxu0 }
 0x3bd   :  { %v3858_v42 = vpop.f32.mrf.mxu0 }
 0x3d5   :  { %v1370_v43 = vpop.f32.mrf.mxu1 }
 0x3d6   :  { %v1371_v44 = vadd.f32 %v1370_v43, %v1281_v39 }
 0x3d7   :  { %v3877_v45 = vpop.f32.mrf.mxu1  ;;  %v1489_v46 = vpop.f32.mrf.mxu0 }
 0x3d8   :  { %v1377_v47 = vadd.f32 %v4840_v51, %v1371_v44  ;;  %v1496_v48 = vadd.f32 %v1489_v46, %v4793_v3 }
 0x3d9   :  { %v1373_v49 = vpop.f32.mrf.mxu1  ;;  %v3897_v50 = vpop.f32.mrf.mxu0 }
 0x3da   :  { %v1374_v52 = vadd.f32 %v1373_v49, %v1284_v41  ;;  %4449 = vtanh.f32 %v1377_v47  ;;  %v4342_v47 = vld [vmem:[#allocation10 + $0x38] sm:$0xff]   ;;  %v4344_v49 = vld [vmem:[#allocation10 + $0x30] sm:$0xff]   ;;  %v4346_v50 = vld [vmem:[#allocation10 + $0x28] sm:$0xff]  }
 0x3db   :  { %v3878_v54 = vpop.f32.mrf.mxu1  ;;  %v1492_v55 = vpop.f32.mrf.mxu0  ;;  %4451 = vtanh.f32 %v1496_v48 }
 0x3dc   :  { %v1378_v56 = vadd.f32 %v4840_v51, %v1374_v52  ;;  %v1497_v57 = vadd.f32 %v1492_v55, %v4797_v7  ;;  %v4334_v7 = vld [vmem:[#allocation13 + $0x30] sm:$0xff]  }
 0x3dd   :  { %v3898_v58 = vpop.f32.mrf.mxu0 }
 0x3de   :  { %4453 = vtanh.f32 %v1378_v56  ;;  %v4348_v56 = vld [vmem:[#allocation10 + $0x20] sm:$0xff]  }
 0x3df   :  { %4455 = vtanh.f32 %v1497_v57 }
 0x3e7   :  { %v4450_v60 = vpop.eup %4449 }
 0x3e8   :  { %v4452_v61 = vpop.eup %4451 }
 0x3eb   :  { %v4454_v62 = vpop.eup %4453 }
 0x3ec   :  { %v4456_v1 = vpop.eup %4455  ;;  %v1519_v3 = vpack.c.bf16 %v4454_v62, %v4450_v60  ;;  %v4352_v62 = vld [vmem:[#allocation10 + $0x10] sm:$0xff]  }
 0x3ed   :  { %v1500_v2 = vpack.c.bf16 %v4456_v1, %v4452_v61  ;;  %v4350_v61 = vld [vmem:[#allocation10 + $0x18] sm:$0xff]   ;;  %v4356_v1 = vld [vmem:[#allocation10] sm:$0xff]  }
 0x3ee   :  { %3916 = vmatmul.mubr.bf16.vlgmr.msra.gmra.mxu1 %v1519_v3 }
 0x3ef   :  { %3936 = vmatmul.mubr.bf16.vlgmr.msra.gmra.mxu0 %v1500_v2  ;;  %3940 = vmatpush3.bf16.msra.mxu1 %v4325_v63 }
 0x3f0   :  { %3941 = vmatprep.subr.bf16.mxu1 %v4652_v0  ;;  %3955 = vmatprep.mubr.msk.bf16.mxu1 %vm4653_vm0, %v4652_v0 }
 0x3f1   :  { %3960 = vmatpush3.bf16.msra.mxu0 %v4333_v4  ;;  %3975 = vmatprep.mubr.msk.bf16.mxu0 %vm4653_vm0, %v4652_v0  ;;  %v4358_v4 = vld [vmem:[#allocation11 + $0x38] sm:$0xff]  }
 0x3f2   :  { %3961 = vmatprep.subr.bf16.mxu0 %v4652_v0 }
 0x3f3   :  { %3942 = vmatpush3.bf16.msra.mxu1 %v4326_v6  ;;  %v4359_v6 = vld [vmem:[#allocation13 + $0x30] sm:$0xff]  }
 0x3f4   :  { %3943 = vmatprep.subr.bf16.mxu1 %v4652_v0 }
 0x3f5   :  { %3962 = vmatpush3.bf16.msra.mxu0 %v4334_v7  ;;  %v4360_v7 = vld [vmem:[#allocation11 + $0x30] sm:$0xff]  }
 0x3f6   :  { %3963 = vmatprep.subr.bf16.mxu0 %v4652_v0 }
 0x3f7   :  { %3944 = vmatpush3.bf16.msra.mxu1 %v4327_v53  ;;  %v4361_v53 = vld [vmem:[#allocation13 + $0x28] sm:$0xff]  }
 0x3f8   :  { %3945 = vmatprep.subr.bf16.mxu1 %v4652_v0 }
 0x3f9   :  { %3964 = vmatpush3.bf16.msra.mxu0 %v4335_v16  ;;  %v4367_v16 = vld [vmem:[#allocation13 + $0x10] sm:$0xff]  }
 0x3fa   :  { %3965 = vmatprep.subr.bf16.mxu0 %v4652_v0 }
 0x3fb   :  { %3946 = vmatpush3.bf16.msra.mxu1 %v4328_v8  ;;  %v4362_v8 = vld [vmem:[#allocation11 + $0x28] sm:$0xff]  }
 0x3fc   :  { %3947 = vmatprep.subr.bf16.mxu1 %v4652_v0 }
 0x3fd   :  { %3966 = vmatpush3.bf16.msra.mxu0 %v4336_v17  ;;  %v4368_v17 = vld [vmem:[#allocation11 + $0x10] sm:$0xff]  }
 0x3fe   :  { %3967 = vmatprep.subr.bf16.mxu0 %v4652_v0 }
 0x3ff   :  { %3948 = vmatpush3.bf16.msra.mxu1 %v4329_v10  ;;  %v4363_v10 = vld [vmem:[#allocation13 + $0x20] sm:$0xff]  }
 0x400   :  { %3949 = vmatprep.subr.bf16.mxu1 %v4652_v0 }
 0x401   :  { %3968 = vmatpush3.bf16.msra.mxu0 %v4337_v9  ;;  %v4369_v9 = vld [vmem:[#allocation13 + $0x8] sm:$0xff]  }
 0x402   :  { %3969 = vmatprep.subr.bf16.mxu0 %v4652_v0 }
 0x403   :  { %3950 = vmatpush3.bf16.msra.mxu1 %v4330_v12  ;;  %v4364_v12 = vld [vmem:[#allocation11 + $0x20] sm:$0xff]  }
 0x404   :  { %3951 = vmatprep.subr.bf16.mxu1 %v4652_v0 }
 0x405   :  { %3970 = vmatpush3.bf16.msra.mxu0 %v4338_v59  ;;  %v4370_v59 = vld [vmem:[#allocation11 + $0x8] sm:$0xff]  }
 0x406   :  { %3971 = vmatprep.subr.bf16.mxu0 %v4652_v0 }
 0x407   :  { %3952 = vmatpush3.bf16.msra.mxu1 %v4331_v14  ;;  %v4365_v14 = vld [vmem:[#allocation13 + $0x18] sm:$0xff]  }
 0x408   :  { %3953 = vmatprep.subr.bf16.mxu1 %v4652_v0 }
 0x409   :  { %3972 = vmatpush3.bf16.msra.mxu0 %v4339_v20  ;;  %v4372_v20 = vld [vmem:[#allocation11] sm:$0xff]  }
 0x40a   :  { %3973 = vmatprep.subr.bf16.mxu0 %v4652_v0 }
 0x40b   :  { %3954 = vmatpush3.bf16.msra.mxu1 %v4332_v5  ;;  %v4366_v5 = vld [vmem:[#allocation11 + $0x18] sm:$0xff]  }
 0x40c   :  { %3979 = vmatprep.subr.bf16.mxu1 %v4652_v0 }
 0x40d   :  { %3974 = vmatpush3.bf16.msra.mxu0 %v4340_v21 }
 0x40e   :  { %3956 = vmatmul.mubr.bf16.vlgmr.msra.gmra.mxu1 %v1500_v2  ;;  %3999 = vmatprep.subr.bf16.mxu0 %v4652_v0  ;;  %v4357_v2 = vld [vmem:[#allocation13 + $0x38] sm:$0xff]  }
 0x40f   :  { %3995 = vmatprep.mubr.msk.bf16.mxu1 %vm4653_vm0, %v4652_v0  ;;  %3980 = vmatpush3.bf16.msra.mxu1 %v4341_v19  ;;  %v4371_v19 = vld [vmem:[#allocation13] sm:$0xff]  }
 0x410   :  { %3981 = vmatprep.subr.bf16.mxu1 %v4652_v0 }
 0x413   :  { %3982 = vmatpush3.bf16.msra.mxu1 %v4343_v22 }
 0x414   :  { %3983 = vmatprep.subr.bf16.mxu1 %v4652_v0 }
 0x417   :  { %3984 = vmatpush3.bf16.msra.mxu1 %v4345_v23 }
 0x418   :  { %3985 = vmatprep.subr.bf16.mxu1 %v4652_v0 }
 0x41b   :  { %3986 = vmatpush3.bf16.msra.mxu1 %v4347_v25 }
 0x41c   :  { %3987 = vmatprep.subr.bf16.mxu1 %v4652_v0 }
 0x41f   :  { %3988 = vmatpush3.bf16.msra.mxu1 %v4349_v27 }
 0x420   :  { %3989 = vmatprep.subr.bf16.mxu1 %v4652_v0 }
 0x423   :  { %3990 = vmatpush3.bf16.msra.mxu1 %v4351_v28 }
 0x424   :  { %3991 = vmatprep.subr.bf16.mxu1 %v4652_v0 }
 0x427   :  { %3992 = vmatpush3.bf16.msra.mxu1 %v4353_v29 }
 0x428   :  { %3993 = vmatprep.subr.bf16.mxu1 %v4652_v0 }
 0x42b   :  { %3994 = vmatpush3.bf16.msra.mxu1 %v4355_v31 }
 0x42c   :  { %4019 = vmatprep.subr.bf16.mxu1 %v4652_v0 }
 0x4ae   :  { %v1618_v33 = vpop.f32.mrf.mxu1 }
 0x4af   :  { %v1707_v34 = vpop.f32.mrf.mxu0 }
 0x4b0   :  { %v1708_v35 = vadd.f32 %v1707_v34, %v1618_v33  ;;  %v3917_v36 = vpop.f32.mrf.mxu1 }
 0x4b1   :  { %v3937_v37 = vpop.f32.mrf.mxu0 }
 0x4b2   :  { %v1621_v38 = vpop.f32.mrf.mxu1  ;;  %v1714_v39 = vadd.f32 %v4840_v51, %v1708_v35 }
 0x4b3   :  { %v1710_v40 = vpop.f32.mrf.mxu0 }
 0x4b4   :  { %v1711_v41 = vadd.f32 %v1710_v40, %v1621_v38  ;;  %v3918_v42 = vpop.f32.mrf.mxu1  ;;  %4457 = vtanh.f32 %v1714_v39 }
 0x4b5   :  { %v3938_v43 = vpop.f32.mrf.mxu0 }
 0x4b6   :  { %v1715_v44 = vadd.f32 %v4840_v51, %v1711_v41 }
 0x4b8   :  { %4459 = vtanh.f32 %v1715_v44 }
 0x4c1   :  { %v4458_v45 = vpop.eup %4457 }
 0x4c5   :  { %v4460_v46 = vpop.eup %4459 }
 0x4c6   :  { %v1856_v48 = vpack.c.bf16 %v4460_v46, %v4458_v45  ;;  %v4373_v46 = vld [vmem:[#allocation10 + $0x38] sm:$0xff]  }
 0x4c8   :  { %3976 = vmatmul.mubr.bf16.vlgmr.msra.gmra.mxu0 %v1856_v48 }
 0x4c9   :  { %4000 = vmatpush3.bf16.msra.mxu0 %v4342_v47  ;;  %4015 = vmatprep.mubr.msk.bf16.mxu0 %vm4653_vm0, %v4652_v0 }
 0x4ca   :  { %4001 = vmatprep.subr.bf16.mxu0 %v4652_v0 }
 0x4cd   :  { %4002 = vmatpush3.bf16.msra.mxu0 %v4344_v49  ;;  %v4381_v49 = vld [vmem:[#allocation13 + $0x38] sm:$0xff]  }
 0x4ce   :  { %v1826_v52 = vpop.f32.mrf.mxu1  ;;  %4003 = vmatprep.subr.bf16.mxu0 %v4652_v0 }
 0x4cf   :  { %v1833_v54 = vadd.f32 %v1826_v52, %v4803_v13  ;;  %v4354_v13 = vld [vmem:[#allocation10 + $0x8] sm:$0xff]   ;;  %v4376_v52 = vld [vmem:[#allocation10 + $0x20] sm:$0xff]  }
 0x4d0   :  { %v3957_v55 = vpop.f32.mrf.mxu1 }
 0x4d1   :  { %4004 = vmatpush3.bf16.msra.mxu0 %v4346_v50  ;;  %4461 = vtanh.f32 %v1833_v54  ;;  %v4374_v50 = vld [vmem:[#allocation10 + $0x30] sm:$0xff]   ;;  %v4377_v54 = vld [vmem:[#allocation10 + $0x18] sm:$0xff]  }
 0x4d2   :  { %v1829_v57 = vpop.f32.mrf.mxu1  ;;  %4005 = vmatprep.subr.bf16.mxu0 %v4652_v0  ;;  %v4378_v55 = vld [vmem:[#allocation10 + $0x10] sm:$0xff]  }
 0x4d3   :  { %v1834_v58 = vadd.f32 %v1829_v57, %v4807_v18  ;;  %v4380_v57 = vld [vmem:[#allocation10] sm:$0xff]  }
 0x4d4   :  { %v3958_v60 = vpop.f32.mrf.mxu1 }
 0x4d5   :  { %4463 = vtanh.f32 %v1834_v58  ;;  %4006 = vmatpush3.bf16.msra.mxu0 %v4348_v56  ;;  %v4379_v56 = vld [vmem:[#allocation10 + $0x8] sm:$0xff]   ;;  %v4384_v60 = vld [vmem:[#allocation13 + $0x20] sm:$0xff]  }
 0x4d6   :  { %4007 = vmatprep.subr.bf16.mxu0 %v4652_v0  ;;  %v4383_v58 = vld [vmem:[#allocation13 + $0x28] sm:$0xff]  }
 0x4d9   :  { %4008 = vmatpush3.bf16.msra.mxu0 %v4350_v61  ;;  %v4385_v61 = vld [vmem:[#allocation13 + $0x18] sm:$0xff]  }
 0x4da   :  { %4009 = vmatprep.subr.bf16.mxu0 %v4652_v0 }
 0x4dd   :  { %4010 = vmatpush3.bf16.msra.mxu0 %v4352_v62  ;;  %v4386_v62 = vld [vmem:[#allocation13 + $0x10] sm:$0xff]  }
 0x4de   :  { %4011 = vmatprep.subr.bf16.mxu0 %v4652_v0  ;;  %v4462_v63 = vpop.eup %4461 }
 0x4e1   :  { %4012 = vmatpush3.bf16.msra.mxu0 %v4354_v13  ;;  %v4389_v13 = vld [vmem:[#allocation11 + $0x38] sm:$0xff]  }
 0x4e2   :  { %v4464_v3 = vpop.eup %4463  ;;  %4013 = vmatprep.subr.bf16.mxu0 %v4652_v0 }
 0x4e3   :  { %v1837_v18 = vpack.c.bf16 %v4464_v3, %v4462_v63  ;;  %v4387_v63 = vld [vmem:[#allocation13 + $0x8] sm:$0xff]   ;;  %v4391_v3 = vld [vmem:[#allocation11 + $0x30] sm:$0xff]  }
 0x4e5   :  { %4014 = vmatpush3.bf16.msra.mxu0 %v4356_v1  ;;  %3996 = vmatmul.mubr.bf16.vlgmr.msra.gmra.mxu1 %v1837_v18  ;;  %v4388_v1 = vld [vmem:[#allocation13] sm:$0xff]  }
 0x4e6   :  { %4039 = vmatprep.subr.bf16.mxu0 %v4652_v0  ;;  %4035 = vmatprep.mubr.msk.bf16.mxu1 %vm4653_vm0, %v4652_v0 }
 0x4e7   :  { %4020 = vmatpush3.bf16.msra.mxu1 %v4357_v2  ;;  %v4395_v2 = vld [vmem:[#allocation11 + $0x20] sm:$0xff]  }
 0x4e8   :  { %4016 = vmatmul.mubr.bf16.vlgmr.msra.gmra.mxu0 %v1837_v18  ;;  %4021 = vmatprep.subr.bf16.mxu1 %v4652_v0  ;;  %v4393_v18 = vld [vmem:[#allocation11 + $0x28] sm:$0xff]  }
 0x4e9   :  { %4055 = vmatprep.mubr.msk.bf16.mxu0 %vm4653_vm0, %v4652_v0  ;;  %4040 = vmatpush3.bf16.msra.mxu0 %v4358_v4  ;;  %v4397_v4 = vld [vmem:[#allocation11 + $0x18] sm:$0xff]  }
 0x4ea   :  { %4041 = vmatprep.subr.bf16.mxu0 %v4652_v0 }
 0x4eb   :  { %4022 = vmatpush3.bf16.msra.mxu1 %v4359_v6  ;;  %v4399_v6 = vld [vmem:[#allocation11 + $0x10] sm:$0xff]  }
 0x4ec   :  { %4023 = vmatprep.subr.bf16.mxu1 %v4652_v0 }
 0x4ed   :  { %4042 = vmatpush3.bf16.msra.mxu0 %v4360_v7  ;;  %v4401_v7 = vld [vmem:[#allocation11 + $0x8] sm:$0xff]  }
 0x4ee   :  { %4043 = vmatprep.subr.bf16.mxu0 %v4652_v0 }
 0x4ef   :  { %4024 = vmatpush3.bf16.msra.mxu1 %v4361_v53  ;;  %v4403_v53 = vld [vmem:[#allocation11] sm:$0xff]  }
 0x4f0   :  { %4025 = vmatprep.subr.bf16.mxu1 %v4652_v0 }
 0x4f1   :  { %4044 = vmatpush3.bf16.msra.mxu0 %v4362_v8 }
 0x4f2   :  { %4045 = vmatprep.subr.bf16.mxu0 %v4652_v0 }
 0x4f3   :  { %4026 = vmatpush3.bf16.msra.mxu1 %v4363_v10 }
 0x4f4   :  { %4027 = vmatprep.subr.bf16.mxu1 %v4652_v0 }
 0x4f5   :  { %4046 = vmatpush3.bf16.msra.mxu0 %v4364_v12 }
 0x4f6   :  { %4047 = vmatprep.subr.bf16.mxu0 %v4652_v0 }
 0x4f7   :  { %4028 = vmatpush3.bf16.msra.mxu1 %v4365_v14 }
 0x4f8   :  { %4029 = vmatprep.subr.bf16.mxu1 %v4652_v0 }
 0x4f9   :  { %4048 = vmatpush3.bf16.msra.mxu0 %v4366_v5 }
 0x4fa   :  { %4049 = vmatprep.subr.bf16.mxu0 %v4652_v0 }
 0x4fb   :  { %4030 = vmatpush3.bf16.msra.mxu1 %v4367_v16 }
 0x4fc   :  { %4031 = vmatprep.subr.bf16.mxu1 %v4652_v0 }
 0x4fd   :  { %4050 = vmatpush3.bf16.msra.mxu0 %v4368_v17  ;;  %v5015_v17 = vld [vmem:[%s5077_s6] ss:$0 sm:$0xff] }
 0x4fe   :  { %4051 = vmatprep.subr.bf16.mxu0 %v4652_v0 }
 0x4ff   :  { %4032 = vmatpush3.bf16.msra.mxu1 %v4369_v9 }
 0x500   :  { %4033 = vmatprep.subr.bf16.mxu1 %v4652_v0 }
 0x501   :  { %4052 = vmatpush3.bf16.msra.mxu0 %v4370_v59 }
 0x502   :  { %4053 = vmatprep.subr.bf16.mxu0 %v4652_v0 }
 0x503   :  { %4034 = vmatpush3.bf16.msra.mxu1 %v4371_v19 }
 0x504   :  { %4059 = vmatprep.subr.bf16.mxu1 %v4652_v0 }
 0x505   :  { %4054 = vmatpush3.bf16.msra.mxu0 %v4372_v20 }
 0x506   :  { %4079 = vmatprep.subr.bf16.mxu0 %v4652_v0 }
 0x588   :  { %v1955_v21 = vpop.f32.mrf.mxu0 }
 0x58a   :  { %v3977_v22 = vpop.f32.mrf.mxu0 }
 0x58c   :  { %v1958_v23 = vpop.f32.mrf.mxu0 }
 0x58e   :  { %v3978_v25 = vpop.f32.mrf.mxu0 }
 0x5a5   :  { %v2044_v27 = vpop.f32.mrf.mxu1 }
 0x5a6   :  { %v2045_v28 = vadd.f32 %v2044_v27, %v1955_v21  ;;  %v4390_v27 = vld [vmem:[#allocation10 + $0x38] sm:$0xff]  }
 0x5a7   :  { %v3997_v29 = vpop.f32.mrf.mxu1 }
 0x5a8   :  { %v2051_v31 = vadd.f32 %v4840_v51, %v2045_v28  ;;  %v2163_v33 = vpop.f32.mrf.mxu0  ;;  %v4392_v29 = vld [vmem:[#allocation10 + $0x30] sm:$0xff]  }
 0x5a9   :  { %v2170_v34 = vadd.f32 %v2163_v33, %v4801_v11  ;;  %v2047_v35 = vpop.f32.mrf.mxu1 }
 0x5aa   :  { %v2048_v36 = vadd.f32 %v2047_v35, %v1958_v23  ;;  %v4017_v37 = vpop.f32.mrf.mxu0  ;;  %4465 = vtanh.f32 %v2051_v31  ;;  %v4394_v31 = vld [vmem:[#allocation10 + $0x28] sm:$0xff]  }
 0x5ab   :  { %v3998_v38 = vpop.f32.mrf.mxu1  ;;  %4467 = vtanh.f32 %v2170_v34 }
 0x5ac   :  { %v2052_v39 = vadd.f32 %v4840_v51, %v2048_v36  ;;  %v2166_v40 = vpop.f32.mrf.mxu0  ;;  %v4375_v51 = vld [vmem:[#allocation10 + $0x28] sm:$0xff]   ;;  %v4396_v36 = vld [vmem:[#allocation10 + $0x20] sm:$0xff]  }
 0x5ad   :  { %v2171_v41 = vadd.f32 %v2166_v40, %v4805_v15  ;;  %v4382_v15 = vld [vmem:[#allocation13 + $0x30] sm:$0xff]   ;;  %v4398_v40 = vld [vmem:[#allocation10 + $0x18] sm:$0xff]  }
 0x5ae   :  { %4469 = vtanh.f32 %v2052_v39  ;;  %v4018_v42 = vpop.f32.mrf.mxu0 }
 0x5af   :  { %4471 = vtanh.f32 %v2171_v41  ;;  %v4400_v41 = vld [vmem:[#allocation10 + $0x10] sm:$0xff]  }
 0x5b7   :  { %v4466_v43 = vpop.eup %4465 }
 0x5b8   :  { %v4468_v44 = vpop.eup %4467 }
 0x5bb   :  { %v4470_v45 = vpop.eup %4469 }
 0x5bc   :  { %v4472_v47 = vpop.eup %4471  ;;  %v2193_v11 = vpack.c.bf16 %v4470_v45, %v4466_v43  ;;  %v4404_v43 = vld [vmem:[#allocation10] sm:$0xff]   ;;  %v4405_v45 = vld [vmem:[#allocation13 + $0x38] sm:$0xff]  }
 0x5bd   :  { %v2174_v48 = vpack.c.bf16 %v4472_v47, %v4468_v44  ;;  %v4407_v47 = vld [vmem:[#allocation13 + $0x30] sm:$0xff]  }
 0x5be   :  { %4036 = vmatmul.mubr.bf16.vlgmr.msra.gmra.mxu1 %v2193_v11  ;;  %v4408_v11 = vld [vmem:[#allocation11 + $0x30] sm:$0xff]  }
 0x5bf   :  { %4056 = vmatmul.mubr.bf16.vlgmr.msra.gmra.mxu0 %v2174_v48  ;;  %4060 = vmatpush3.bf16.msra.mxu1 %v4373_v46  ;;  %v4406_v46 = vld [vmem:[#allocation11 + $0x38] sm:$0xff]  }
 0x5c0   :  { %4061 = vmatprep.subr.bf16.mxu1 %v4652_v0  ;;  %4075 = vmatprep.mubr.msk.bf16.mxu1 %vm4653_vm0, %v4652_v0 }
 0x5c1   :  { %4080 = vmatpush3.bf16.msra.mxu0 %v4381_v49  ;;  %4095 = vmatprep.mubr.msk.bf16.mxu0 %vm4653_vm0, %v4652_v0  ;;  %v4410_v49 = vld [vmem:[#allocation11 + $0x28] sm:$0xff]  }
 0x5c2   :  { %4081 = vmatprep.subr.bf16.mxu0 %v4652_v0 }
 0x5c3   :  { %4062 = vmatpush3.bf16.msra.mxu1 %v4374_v50  ;;  %v4411_v50 = vld [vmem:[#allocation13 + $0x20] sm:$0xff]  }
 0x5c4   :  { %4063 = vmatprep.subr.bf16.mxu1 %v4652_v0 }
 0x5c5   :  { %4082 = vmatpush3.bf16.msra.mxu0 %v4382_v15  ;;  %v4412_v15 = vld [vmem:[#allocation11 + $0x20] sm:$0xff]  }
 0x5c6   :  { %4083 = vmatprep.subr.bf16.mxu0 %v4652_v0 }
 0x5c7   :  { %4064 = vmatpush3.bf16.msra.mxu1 %v4375_v51  ;;  %v4413_v51 = vld [vmem:[#allocation13 + $0x18] sm:$0xff]  }
 0x5c8   :  { %4065 = vmatprep.subr.bf16.mxu1 %v4652_v0 }
 0x5c9   :  { %4084 = vmatpush3.bf16.msra.mxu0 %v4383_v58  ;;  %v4419_v58 = vld [vmem:[#allocation13] sm:$0xff]  }
 0x5ca   :  { %4085 = vmatprep.subr.bf16.mxu0 %v4652_v0 }
 0x5cb   :  { %4066 = vmatpush3.bf16.msra.mxu1 %v4376_v52  ;;  %v4414_v52 = vld [vmem:[#allocation11 + $0x18] sm:$0xff]  }
 0x5cc   :  { %4067 = vmatprep.subr.bf16.mxu1 %v4652_v0 }
 0x5cd   :  { %4086 = vmatpush3.bf16.msra.mxu0 %v4384_v60  ;;  %v4420_v60 = vld [vmem:[#allocation11] sm:$0xff]  }
 0x5ce   :  { %4087 = vmatprep.subr.bf16.mxu0 %v4652_v0 }
 0x5cf   :  { %4068 = vmatpush3.bf16.msra.mxu1 %v4377_v54  ;;  %v4415_v54 = vld [vmem:[#allocation13 + $0x10] sm:$0xff]  }
 0x5d0   :  { %4069 = vmatprep.subr.bf16.mxu1 %v4652_v0 }
 0x5d1   :  { %4088 = vmatpush3.bf16.msra.mxu0 %v4385_v61 }
 0x5d2   :  { %4089 = vmatprep.subr.bf16.mxu0 %v4652_v0 }
 0x5d3   :  { %4070 = vmatpush3.bf16.msra.mxu1 %v4378_v55  ;;  %v4416_v55 = vld [vmem:[#allocation11 + $0x10] sm:$0xff]  }
 0x5d4   :  { %4071 = vmatprep.subr.bf16.mxu1 %v4652_v0 }
 0x5d5   :  { %4090 = vmatpush3.bf16.msra.mxu0 %v4386_v62 }
 0x5d6   :  { %4091 = vmatprep.subr.bf16.mxu0 %v4652_v0 }
 0x5d7   :  { %4072 = vmatpush3.bf16.msra.mxu1 %v4379_v56  ;;  %v4417_v56 = vld [vmem:[#allocation13 + $0x8] sm:$0xff]  }
 0x5d8   :  { %4073 = vmatprep.subr.bf16.mxu1 %v4652_v0 }
 0x5d9   :  { %4092 = vmatpush3.bf16.msra.mxu0 %v4387_v63 }
 0x5da   :  { %4093 = vmatprep.subr.bf16.mxu0 %v4652_v0 }
 0x5db   :  { %4074 = vmatpush3.bf16.msra.mxu1 %v4380_v57  ;;  %v4418_v57 = vld [vmem:[#allocation11 + $0x8] sm:$0xff]  }
 0x5dc   :  { %4099 = vmatprep.subr.bf16.mxu1 %v4652_v0 }
 0x5dd   :  { %4094 = vmatpush3.bf16.msra.mxu0 %v4388_v1 }
 0x5de   :  { %4076 = vmatmul.mubr.bf16.vlgmr.msra.gmra.mxu1 %v2174_v48  ;;  %4119 = vmatprep.subr.bf16.mxu0 %v4652_v0  ;;  %v4409_v48 = vld [vmem:[#allocation13 + $0x28] sm:$0xff]  }
 0x5df   :  { %4115 = vmatprep.mubr.msk.bf16.mxu1 %vm4653_vm0, %v4652_v0  ;;  %4100 = vmatpush3.bf16.msra.mxu1 %v4389_v13 }
 0x5e0   :  { %4101 = vmatprep.subr.bf16.mxu1 %v4652_v0 }
 0x5e3   :  { %4102 = vmatpush3.bf16.msra.mxu1 %v4391_v3 }
 0x5e4   :  { %4103 = vmatprep.subr.bf16.mxu1 %v4652_v0 }
 0x5e7   :  { %4104 = vmatpush3.bf16.msra.mxu1 %v4393_v18 }
 0x5e8   :  { %4105 = vmatprep.subr.bf16.mxu1 %v4652_v0 }
 0x5eb   :  { %4106 = vmatpush3.bf16.msra.mxu1 %v4395_v2 }
 0x5ec   :  { %4107 = vmatprep.subr.bf16.mxu1 %v4652_v0 }
 0x5ef   :  { %4108 = vmatpush3.bf16.msra.mxu1 %v4397_v4 }
 0x5f0   :  { %4109 = vmatprep.subr.bf16.mxu1 %v4652_v0 }
 0x5f3   :  { %4110 = vmatpush3.bf16.msra.mxu1 %v4399_v6 }
 0x5f4   :  { %4111 = vmatprep.subr.bf16.mxu1 %v4652_v0 }
 0x5f7   :  { %4112 = vmatpush3.bf16.msra.mxu1 %v4401_v7 }
 0x5f8   :  { %4113 = vmatprep.subr.bf16.mxu1 %v4652_v0 }
 0x5fb   :  { %4114 = vmatpush3.bf16.msra.mxu1 %v4403_v53 }
 0x5fc   :  { %4139 = vmatprep.subr.bf16.mxu1 %v4652_v0 }
 0x67e   :  { %v2292_v8 = vpop.f32.mrf.mxu1 }
 0x67f   :  { %v2381_v10 = vpop.f32.mrf.mxu0 }
 0x680   :  { %v2382_v12 = vadd.f32 %v2381_v10, %v2292_v8  ;;  %v4037_v14 = vpop.f32.mrf.mxu1 }
 0x681   :  { %v4057_v5 = vpop.f32.mrf.mxu0 }
 0x682   :  { %v2295_v16 = vpop.f32.mrf.mxu1  ;;  %v2388_v9 = vadd.f32 %v5015_v17, %v2382_v12 }
 0x683   :  { %v2384_v59 = vpop.f32.mrf.mxu0 }
 0x684   :  { %v2385_v19 = vadd.f32 %v2384_v59, %v2295_v16  ;;  %v4038_v20 = vpop.f32.mrf.mxu1  ;;  %4473 = vtanh.f32 %v2388_v9 }
 0x685   :  { %v4058_v21 = vpop.f32.mrf.mxu0  ;;  %v4421_v20 = vld [vmem:[#allocation14 + $0x38] sm:$0xff]  }
 0x686   :  { %v2389_v22 = vadd.f32 %v5015_v17, %v2385_v19 }
 0x688   :  { %4475 = vtanh.f32 %v2389_v22 }
 0x691   :  { %v4474_v23 = vpop.eup %4473 }
 0x695   :  { %v4476_v25 = vpop.eup %4475 }
 0x696   :  { %v2530_v28 = vpack.c.bf16 %v4476_v25, %v4474_v23  ;;  %v4422_v23 = vld [vmem:[#allocation14 + $0x30] sm:$0xff]   ;;  %v4424_v25 = vld [vmem:[#allocation14 + $0x20] sm:$0xff]  }
 0x698   :  { %4096 = vmatmul.mubr.bf16.vlgmr.msra.gmra.mxu0 %v2530_v28  ;;  %v4426_v28 = vld [vmem:[#allocation14 + $0x10] sm:$0xff]  }
 0x699   :  { %4120 = vmatpush3.bf16.msra.mxu0 %v4390_v27  ;;  %4135 = vmatprep.mubr.msk.bf16.mxu0 %vm4653_vm0, %v4652_v0  ;;  %v4425_v27 = vld [vmem:[#allocation14 + $0x18] sm:$0xff]  }
 0x69a   :  { %4121 = vmatprep.subr.bf16.mxu0 %v4652_v0 }
 0x69d   :  { %4122 = vmatpush3.bf16.msra.mxu0 %v4392_v29  ;;  %v4427_v29 = vld [vmem:[#allocation14 + $0x8] sm:$0xff]  }
 0x69e   :  { %v2500_v33 = vpop.f32.mrf.mxu1  ;;  %4123 = vmatprep.subr.bf16.mxu0 %v4652_v0 }
 0x69f   :  { %v2507_v34 = vadd.f32 %v2500_v33, %v4811_v26  ;;  %v4402_v26 = vld [vmem:[#allocation10 + $0x8] sm:$0xff]  }
 0x6a0   :  { %v4077_v35 = vpop.f32.mrf.mxu1 }
 0x6a1   :  { %4124 = vmatpush3.bf16.msra.mxu0 %v4394_v31  ;;  %4477 = vtanh.f32 %v2507_v34  ;;  %v4428_v31 = vld [vmem:[#allocation14] sm:$0xff]  }
 0x6a2   :  { %v2503_v37 = vpop.f32.mrf.mxu1  ;;  %4125 = vmatprep.subr.bf16.mxu0 %v4652_v0 }
 0x6a3   :  { %v2508_v38 = vadd.f32 %v2503_v37, %v4821_v32 }
 0x6a4   :  { %v4078_v39 = vpop.f32.mrf.mxu1 }
 0x6a5   :  { %4479 = vtanh.f32 %v2508_v38  ;;  %4126 = vmatpush3.bf16.msra.mxu0 %v4396_v36 }
 0x6a6   :  { %4127 = vmatprep.subr.bf16.mxu0 %v4652_v0 }
 0x6a9   :  { %4128 = vmatpush3.bf16.msra.mxu0 %v4398_v40 }
 0x6aa   :  { %4129 = vmatprep.subr.bf16.mxu0 %v4652_v0 }
 0x6ad   :  { %4130 = vmatpush3.bf16.msra.mxu0 %v4400_v41 }
 0x6ae   :  { %4131 = vmatprep.subr.bf16.mxu0 %v4652_v0  ;;  %v4478_v42 = vpop.eup %4477 }
 0x6b1   :  { %4132 = vmatpush3.bf16.msra.mxu0 %v4402_v26 }
 0x6b2   :  { %v4480_v44 = vpop.eup %4479  ;;  %4133 = vmatprep.subr.bf16.mxu0 %v4652_v0 }
 0x6b3   :  { %v2511_v32 = vpack.c.bf16 %v4480_v44, %v4478_v42 }
 0x6b5   :  { %4134 = vmatpush3.bf16.msra.mxu0 %v4404_v43  ;;  %4116 = vmatmul.mubr.bf16.vlgmr.msra.gmra.mxu1 %v2511_v32 }
 0x6b6   :  { %4159 = vmatprep.subr.bf16.mxu0 %v4652_v0  ;;  %4155 = vmatprep.mubr.msk.bf16.mxu1 %vm4653_vm0, %v4652_v0 }
 0x6b7   :  { %4140 = vmatpush3.bf16.msra.mxu1 %v4405_v45  ;;  %v3417_v45 = vld [vmem:[%s5079_s8] ss:$0 sm:$0xff] }
 0x6b8   :  { %4136 = vmatmul.mubr.bf16.vlgmr.msra.gmra.mxu0 %v2511_v32  ;;  %4141 = vmatprep.subr.bf16.mxu1 %v4652_v0 }
 0x6b9   :  { %4175 = vmatprep.mubr.msk.bf16.mxu0 %vm4653_vm0, %v4652_v0  ;;  %4160 = vmatpush3.bf16.msra.mxu0 %v4406_v46 }
 0x6ba   :  { %4161 = vmatprep.subr.bf16.mxu0 %v4652_v0 }
 0x6bb   :  { %4142 = vmatpush3.bf16.msra.mxu1 %v4407_v47 }
 0x6bc   :  { %4143 = vmatprep.subr.bf16.mxu1 %v4652_v0 }
 0x6bd   :  { %4162 = vmatpush3.bf16.msra.mxu0 %v4408_v11 }
 0x6be   :  { %4163 = vmatprep.subr.bf16.mxu0 %v4652_v0 }
 0x6bf   :  { %4144 = vmatpush3.bf16.msra.mxu1 %v4409_v48 }
 0x6c0   :  { %4145 = vmatprep.subr.bf16.mxu1 %v4652_v0 }
 0x6c1   :  { %4164 = vmatpush3.bf16.msra.mxu0 %v4410_v49 }
 0x6c2   :  { %4165 = vmatprep.subr.bf16.mxu0 %v4652_v0 }
 0x6c3   :  { %4146 = vmatpush3.bf16.msra.mxu1 %v4411_v50 }
 0x6c4   :  { %4147 = vmatprep.subr.bf16.mxu1 %v4652_v0 }
 0x6c5   :  { %4166 = vmatpush3.bf16.msra.mxu0 %v4412_v15 }
 0x6c6   :  { %4167 = vmatprep.subr.bf16.mxu0 %v4652_v0 }
 0x6c7   :  { %4148 = vmatpush3.bf16.msra.mxu1 %v4413_v51 }
 0x6c8   :  { %4149 = vmatprep.subr.bf16.mxu1 %v4652_v0 }
 0x6c9   :  { %4168 = vmatpush3.bf16.msra.mxu0 %v4414_v52 }
 0x6ca   :  { %4169 = vmatprep.subr.bf16.mxu0 %v4652_v0 }
 0x6cb   :  { %4150 = vmatpush3.bf16.msra.mxu1 %v4415_v54 }
 0x6cc   :  { %4151 = vmatprep.subr.bf16.mxu1 %v4652_v0 }
 0x6cd   :  { %4170 = vmatpush3.bf16.msra.mxu0 %v4416_v55 }
 0x6ce   :  { %4171 = vmatprep.subr.bf16.mxu0 %v4652_v0 }
 0x6cf   :  { %4152 = vmatpush3.bf16.msra.mxu1 %v4417_v56 }
 0x6d0   :  { %4153 = vmatprep.subr.bf16.mxu1 %v4652_v0 }
 0x6d1   :  { %4172 = vmatpush3.bf16.msra.mxu0 %v4418_v57 }
 0x6d2   :  { %4173 = vmatprep.subr.bf16.mxu0 %v4652_v0 }
 0x6d3   :  { %4154 = vmatpush3.bf16.msra.mxu1 %v4419_v58 }
 0x6d4   :  { %4179 = vmatprep.subr.bf16.mxu1 %v4652_v0 }
 0x6d5   :  { %4174 = vmatpush3.bf16.msra.mxu0 %v4420_v60 }
 0x758   :  { %v2629_v61 = vpop.f32.mrf.mxu0 }
 0x75a   :  { %v4097_v62 = vpop.f32.mrf.mxu0 }
 0x75c   :  { %v2632_v13 = vpop.f32.mrf.mxu0 }
 0x75e   :  { %v4098_v63 = vpop.f32.mrf.mxu0 }
 0x775   :  { %v2718_v1 = vpop.f32.mrf.mxu1 }
 0x776   :  { %v2719_v3 = vadd.f32 %v2718_v1, %v2629_v61 }
 0x777   :  { %v4117_v18 = vpop.f32.mrf.mxu1 }
 0x778   :  { %v2725_v2 = vadd.f32 %v5015_v17, %v2719_v3  ;;  %v2837_v4 = vpop.f32.mrf.mxu0 }
 0x779   :  { %v2844_v6 = vadd.f32 %v2837_v4, %v4809_v24  ;;  %v2721_v7 = vpop.f32.mrf.mxu1 }
 0x77a   :  { %v2722_v53 = vadd.f32 %v2721_v7, %v2632_v13  ;;  %v4137_v8 = vpop.f32.mrf.mxu0  ;;  %4481 = vtanh.f32 %v2725_v2 }
 0x77b   :  { %v4118_v10 = vpop.f32.mrf.mxu1  ;;  %4483 = vtanh.f32 %v2844_v6 }
 0x77c   :  { %v2726_v12 = vadd.f32 %v5015_v17, %v2722_v53  ;;  %v2840_v14 = vpop.f32.mrf.mxu0 }
 0x77d   :  { %v2845_v5 = vadd.f32 %v2840_v14, %v4813_v30  ;;  %v4423_v30 = vld [vmem:[#allocation14 + $0x28] sm:$0xff]  }
 0x77e   :  { %4485 = vtanh.f32 %v2726_v12  ;;  %v4138_v16 = vpop.f32.mrf.mxu0 }
 0x77f   :  { %4487 = vtanh.f32 %v2845_v5 }
 0x787   :  { %v4482_v9 = vpop.eup %4481 }
 0x788   :  { %v4484_v59 = vpop.eup %4483 }
 0x78b   :  { %v4486_v19 = vpop.eup %4485 }
 0x78c   :  { %v4488_v21 = vpop.eup %4487  ;;  %v2867_v24 = vpack.c.bf16 %v4486_v19, %v4482_v9 }
 0x78d   :  { %v2848_v22 = vpack.c.bf16 %v4488_v21, %v4484_v59 }
 0x78e   :  { %4156 = vmatmul.mubr.bf16.vlgmr.msra.gmra.mxu1 %v2867_v24 }
 0x78f   :  { %4176 = vmatmul.mubr.bf16.vlgmr.msra.gmra.mxu0 %v2848_v22  ;;  %4180 = vmatpush3.bf16.msra.mxu1 %v4421_v20 }
 0x790   :  { %4181 = vmatprep.subr.bf16.mxu1 %v4652_v0  ;;  %4195 = vmatprep.mubr.msk.bf16.mxu1 %vm4653_vm0, %v4652_v0 }
 0x793   :  { %4182 = vmatpush3.bf16.msra.mxu1 %v4422_v23 }
 0x794   :  { %4183 = vmatprep.subr.bf16.mxu1 %v4652_v0 }
 0x797   :  { %4184 = vmatpush3.bf16.msra.mxu1 %v4423_v30 }
 0x798   :  { %4185 = vmatprep.subr.bf16.mxu1 %v4652_v0 }
 0x79b   :  { %4186 = vmatpush3.bf16.msra.mxu1 %v4424_v25 }
 0x79c   :  { %4187 = vmatprep.subr.bf16.mxu1 %v4652_v0 }
 0x79f   :  { %4188 = vmatpush3.bf16.msra.mxu1 %v4425_v27 }
 0x7a0   :  { %4189 = vmatprep.subr.bf16.mxu1 %v4652_v0 }
 0x7a3   :  { %4190 = vmatpush3.bf16.msra.mxu1 %v4426_v28 }
 0x7a4   :  { %4191 = vmatprep.subr.bf16.mxu1 %v4652_v0 }
 0x7a7   :  { %4192 = vmatpush3.bf16.msra.mxu1 %v4427_v29 }
 0x7a8   :  { %4193 = vmatprep.subr.bf16.mxu1 %v4652_v0 }
 0x7ab   :  { %4194 = vmatpush3.bf16.msra.mxu1 %v4428_v31 }
 0x84e   :  { %v2966_v33 = vpop.f32.mrf.mxu1 }
 0x84f   :  { %v3055_v34 = vpop.f32.mrf.mxu0 }
 0x850   :  { %v3056_v35 = vadd.f32 %v3055_v34, %v2966_v33  ;;  %v4157_v36 = vpop.f32.mrf.mxu1 }
 0x851   :  { %v4177_v37 = vpop.f32.mrf.mxu0 }
 0x852   :  { %v2969_v38 = vpop.f32.mrf.mxu1  ;;  %v3062_v39 = vadd.f32 %v5015_v17, %v3056_v35 }
 0x853   :  { %v3058_v40 = vpop.f32.mrf.mxu0 }
 0x854   :  { %v3059_v41 = vadd.f32 %v3058_v40, %v2969_v38  ;;  %v4158_v26 = vpop.f32.mrf.mxu1  ;;  %4489 = vtanh.f32 %v3062_v39 }
 0x855   :  { %v4178_v42 = vpop.f32.mrf.mxu0 }
 0x856   :  { %v3063_v43 = vadd.f32 %v5015_v17, %v3059_v41 }
 0x858   :  { %4491 = vtanh.f32 %v3063_v43 }
 0x861   :  { %v4490_v44 = vpop.eup %4489 }
 0x865   :  { %v4492_v32 = vpop.eup %4491 }
 0x866   :  { %v3072_v0 = vpack.c.bf16 %v4492_v32, %v4490_v44 }
 0x868   :  { %4196 = vmatmul.mubr.bf16.vlgmr.msra.gmra.mxu1 %v3072_v0 }
 0x928   :  { %v3178_v46 = vpop.f32.mrf.mxu1 }
 0x929   :  { %v3179_v47 = vadd.f32 %v3417_v45, %v3178_v46 }
 0x92a   :  { %v4197_v11 = vpop.f32.mrf.mxu1 }
 0x92b   :  { %3185 = vst [vmem:[#allocation16] sm:$0xff] %v3179_v47 }
 0x92c   :  { %v3181_v48 = vpop.f32.mrf.mxu1 }
 0x92d   :  { %v3182_v49 = vadd.f32 %v3417_v45, %v3181_v48 }
 0x92e   :  { %v4198_v17 = vpop.f32.mrf.mxu1 }
 0x92f   :  { %3186 = vst [vmem:[#allocation16 + $0x8] sm:$0xff] %v3182_v49 }
 0x930   :  { %4625 = shalt.err (!%p4622_p6)
}
 0x931   :  { %s4656_s23 = smov 128   ;;  %s4657_s8 = smov 8  }
 0x932   :  { %3198 = dma.vmem_to_hbm [thread:$0]  %s3193_s21, 256, %s5080_s9, [#allocation7], %s4656_s23, %s4656_s23, %s4657_s8  }
 0x933   :  { %4642 = dma.done.wait [#allocation7], 256  }
 0x934   :  { %4643 = vsyncadd [#allocation7], 4294967040 }
 0x935   :  { %3202 = vsyncpa [#allocation6], 1 }
 0x936   :  { %3203 = vsyncpa [#allocation9], 1 }
 0x937   :  { %3204 = vsyncpa [#allocation12], 1 }
 0x938   :  { %3205 = vsyncpa [#allocation15], 1 }
 0x939   :  { %3206 = vsyncpa [#allocation7], 1 }

</bundles_post_ra>
